<compile_context>
chip_gen: v7x
topology: tpu7x:2x2x1
jax: 0.10.0
libtpu: 0.0.40
codegen_flags: <defaults>
</compile_context>

<pallas_src>
import functools

import jax
import jax.numpy as jnp
import numpy as np
from jax.experimental import pallas as pl
from jax.experimental.pallas import tpu as pltpu


# ----------------------------- kernel body ---------------------------------


def cv_nn_special_kernel(
    featT_ref,        # (D, TB)          batch tile of input features, batch on lanes
    wfeatT_ref,       # (F, D)           fused & transposed feat-projection weights
    wqT_ref,          # (NB, W, W)       per-res-block q weights, transposed (q = WqT @ x)
    cols_ref,         # (2D+F+NB*W+W, 1) scale | shift | b_feat | b_q | w_out packed
    out_ref,          # (1, TB)          lane-dense output row
    *, n_res_blocks, width, input_dim, compute_dtype, approx_recip,
):
    W = width
    D = input_dim
    NB = n_res_blocks
    F = (3 + 2 * NB) * W

    # --- unpack packed column parameters (static sublane slices, zero cost) ---
    o = 0
    scale = cols_ref[o:o + D, :]; o += D            # (D, 1)   relu(kb) / std
    shift = cols_ref[o:o + D, :]; o += D            # (D, 1)   -mean * scale
    bfeat = cols_ref[o:o + F, :]; o += F            # (F, 1)   fused projection biases
    bq = cols_ref[o:o + NB * W, :]; o += NB * W     # (NB*W, 1)
    wout = cols_ref[o:o + W, :]                     # (W, 1)   output layer (bias=False)

    def fast_softmax_mul(q, k, v):
        # FastSoftmax(alpha=1.0) applied to q*k, then multiplied by v.
        qk = jnp.abs(q * k)                                           # (W, TB)
        s = jnp.sum(qk, axis=0, keepdims=True).astype(jnp.float32)    # (1, TB)
        # Guard against division by ~0 (zero-padded batch columns / degenerate
        # inputs).  Real sums are >> 1e-30, so real results are unchanged.
        s = jnp.maximum(s, 1e-30)
        if approx_recip:
            inv = pl.reciprocal(s, approx=True)   # EUP vrcp, nearly free
        else:
            inv = 1.0 / s
        return qk * inv.astype(qk.dtype) * v

    # whitening + estimate_masked_kernel folded into a single FMA:
    #   relu(kb) * (x - mean)/std == x*scale + shift   (precomputed in wrapper).
    feat = featT_ref[...] * scale + shift                             # (D, TB) f32

    # --- ONE fused matmul for every feat-dependent projection:
    #     first-layer q|k|v + k|v of every residual block, then one tanh burst.
    h = jnp.dot(wfeatT_ref[...], feat, preferred_element_type=jnp.float32)  # (F, TB)
    h = jnp.tanh((h + bfeat).astype(compute_dtype))                   # (F, TB)

    # --- first layer: x = tanh(attn(feat, feat)) ---
    x = jnp.tanh(fast_softmax_mul(h[0:W], h[W:2 * W], h[2 * W:3 * W]))
    x = x.astype(jnp.float32)                                         # (W, TB)

    # --- residual blocks (res_skip=1): y = tanh(attn(feat, x)); x = x + y ---
    for b in range(NB):
        off = (3 + 2 * b) * W
        k_h = h[off:off + W]                                          # (W, TB)
        v_h = h[off + W:off + 2 * W]                                  # (W, TB)
        qp = jnp.dot(wqT_ref[b], x, preferred_element_type=jnp.float32)
        qb = jnp.tanh((qp + bq[b * W:(b + 1) * W, :]).astype(compute_dtype))
        y = jnp.tanh(fast_softmax_mul(qb, k_h, v_h))
        x = x + y.astype(jnp.float32)

    # --- output layer: Linear(width, 1, bias=False) as a VPU multiply + sublane
    # reduce; the (1, TB) result is lane-dense -> unmasked vector stores.
    out_ref[...] = jnp.sum(x * wout, axis=0, keepdims=True)


# ----------------------------- wrapper --------------------------------------


def _round_up(x, m):
    return ((x + m - 1) // m) * m


def _tpu_generation():
    """Best-effort TPU generation from the device kind string (5/6/7 or None)."""
    try:
        kind = jax.devices()[0].device_kind.lower()
    except Exception:
        return None
    if "v7" in kind or "7x" in kind:
        return 7
    if "v6" in kind:
        return 6
    if "v5" in kind:
        return 5
    if "v4" in kind:
        return 4
    return None


def _choose_block_b(B, max_block=2048):
    """Generation-aware batch tile (lane axis, multiple of 128).

    v5e / v6e have a single TensorCore, so one big tile (grid=(1,)) avoids the
    ~0.35us fixed cost of extra grid steps.  Only on v7x (2 TCs/chip) do we
    split the batch in two -- and only when each half is >= ~512 rows,
    otherwise one overhead-free step on one core wins.
    """
    full = _round_up(max(B, 128), 128)
    gen = _tpu_generation()
    if gen is not None and gen >= 7 and B >= 1024:
        half = _round_up(pl.cdiv(B, 2), 128)
        return min(max_block, half)
    return min(max_block, full)


def cv_nn_special_forward(features, params, *, block_b=None,
                          compute_dtype=jnp.float32, approx_recip=True):
    """CV_NN_special forward with module defaults: rewiring=True, residual=True,
    n_res_blocks=4, res_skip=1, Tanh, FastSoftmax(alpha=1.0), final_bias=False,
    sigma_feat_mask=0.0."""
    B, D = features.shape
    W = params["wq1"].shape[1]
    NB = params["wq"].shape[0]
    F = (3 + 2 * NB) * W

    # ---- parameter preprocessing (plain JAX, runs once, outside the kernel) ----
    # Fold whitening + relu(kernel_bottleneck) mask into column scale/shift.
    scale = (jnp.maximum(params["kernel_bottleneck"], 0.0)
             / params["std"]).reshape(D, 1)
    shift = (-params["mean"]).reshape(D, 1) * scale

    # Fuse ALL feat-dependent projections (first-layer q|k|v + every res block's
    # k|v) into one weight / bias, stored transposed for batch-on-lanes.
    w_parts = [params["wq1"], params["wk1"], params["wv1"]]
    b_parts = [params["bq1"], params["bk1"], params["bv1"]]
    for b in range(NB):
        w_parts += [params["wk"][b], params["wv"][b]]
        b_parts += [params["bk"][b], params["bv"][b]]
    wfeatT = jnp.concatenate(w_parts, axis=1).T                       # (F, D)
    bfeat = jnp.concatenate(b_parts, axis=1).reshape(F, 1)            # (F, 1)

    wqT = jnp.transpose(params["wq"], (0, 2, 1))                      # (NB, W, W)
    bq_col = params["bq"].reshape(NB * W, 1)                          # (NB*W, 1)
    wout_col = params["wout"].reshape(W, 1)                           # (W, 1)

    # One packed "columns" array -> a single DMA descriptor instead of five.
    cols = jnp.concatenate([scale, shift, bfeat, bq_col, wout_col], axis=0)

    # ---- batch tiling: batch sits on the 128-lane axis ----
    if block_b is None:
        block_b = _choose_block_b(B)
    block_b = _round_up(block_b, 128)
    Bp = _round_up(max(B, block_b), block_b)
    featT = jnp.pad(features.astype(jnp.float32), ((0, Bp - B), (0, 0))).T  # (D, Bp)
    grid = (Bp // block_b,)

    kernel = functools.partial(
        cv_nn_special_kernel,
        n_res_blocks=NB, width=W, input_dim=D,
        compute_dtype=compute_dtype, approx_recip=approx_recip)

    # Weights are grid-invariant (constant index maps) and resident in VMEM.
    # NOTE: with 1-2 grid steps the 2x double-buffering of these tiny constant
    # blocks is harmless; add pipeline_mode=pl.Buffered(1) only if D/W grow big.
    def const_spec(arr):
        return pl.BlockSpec(arr.shape, lambda i, _n=arr.ndim: (0,) * _n)

    out = pl.pallas_call(
        kernel,
        out_shape=jax.ShapeDtypeStruct((1, Bp), jnp.float32),
        grid=grid,
        in_specs=[pl.BlockSpec((D, block_b), lambda i: (0, i)),
                  const_spec(wfeatT), const_spec(wqT), const_spec(cols)],
        out_specs=pl.BlockSpec((1, block_b), lambda i: (0, i)),
        compiler_params=pltpu.CompilerParams(
            dimension_semantics=("parallel",)),
    )(featT, wfeatT, wqT, cols)

    return out[0, :B].reshape(B, 1)


# ------------------------ deterministic parameter init ----------------------


def init_params(key, input_dim, width, n_res_blocks):
    """Deterministic synthetic parameters matching the module's shapes."""
    def linear(k, din, dout):
        bound = 1.0 / np.sqrt(din)
        kw, kb = jax.random.split(k)
        w = jax.random.uniform(kw, (din, dout), jnp.float32, -bound, bound)
        b = jax.random.uniform(kb, (1, dout), jnp.float32, -bound, bound)
        return w, b

    keys = jax.random.split(key, 4 + 3 * n_res_blocks)
    wq1, bq1 = linear(keys[0], input_dim, width)
    wk1, bk1 = linear(keys[1], input_dim, width)
    wv1, bv1 = linear(keys[2], input_dim, width)

    wq, bq, wk, bk, wv, bv = [], [], [], [], [], []
    for r in range(n_res_blocks):
        a, pa = linear(keys[3 + 3 * r + 0], width, width)
        b, pb = linear(keys[3 + 3 * r + 1], input_dim, width)
        c, pc = linear(keys[3 + 3 * r + 2], input_dim, width)
        wq.append(a); bq.append(pa)
        wk.append(b); bk.append(pb)
        wv.append(c); bv.append(pc)

    # kernel_bottleneck is initialised to ones in the module; perturb it
    # deterministically so the ReLU mask is non-trivial.
    kb = 1.0 + 0.5 * jax.random.normal(keys[-1], (1, input_dim), jnp.float32)

    params = dict(
        mean=jnp.zeros((1, input_dim), jnp.float32),        # Mean_std_layer defaults
        std=jnp.ones((1, input_dim), jnp.float32),
        kernel_bottleneck=kb,
        wq1=wq1, bq1=bq1, wk1=wk1, bk1=bk1, wv1=wv1, bv1=bv1,
        wq=jnp.stack(wq), bq=jnp.stack(bq),
        wk=jnp.stack(wk), bk=jnp.stack(bk),
        wv=jnp.stack(wv), bv=jnp.stack(bv),
        wout=jax.random.uniform(
            keys[-2], (width, 1), jnp.float32,
            -1.0 / np.sqrt(width), 1.0 / np.sqrt(width)),
    )
    return params


# ----------------------------- pure-JAX reference ----------------------------


def reference_forward(features, p):
    feat = (features - p["mean"]) / p["std"]
    feat = feat * jnp.maximum(p["kernel_bottleneck"], 0.0)

    def attn(q_in, k_in, wq, bq, wk, bk, wv, bv):
        q = jnp.tanh(q_in @ wq + bq)
        k = jnp.tanh(k_in @ wk + bk)
        v = jnp.tanh(k_in @ wv + bv)
        qk = jnp.abs(q * k)
        qk = qk / jnp.sum(qk, axis=-1, keepdims=True)
        return qk * v

    x = jnp.tanh(attn(feat, feat, p["wq1"], p["bq1"], p["wk1"],
                      p["bk1"], p["wv1"], p["bv1"]))
    for b in range(p["wq"].shape[0]):
        y = jnp.tanh(attn(x, feat, p["wq"][b], p["bq"][b], p["wk"][b],
                          p["bk"][b], p["wv"][b], p["bv"][b]))
        x = x + y
    return x @ p["wout"]


# ----------------------------- main ------------------------------------------


if __name__ == "__main__":
    # batch, input_dim, width, n_res_blocks
    B, D, W, NB = 256, 16, 32, 4

    key = jax.random.PRNGKey(0)
    k_feat, k_params = jax.random.split(key)
    features = jax.random.normal(k_feat, (B, D), jnp.float32)
    params = init_params(k_params, D, W, NB)

    out = cv_nn_special_forward(features, params)
    out = jax.block_until_ready(out)

    ref = reference_forward(features, params)
    # Tolerance 5e-3 accommodates the EUP approximate reciprocal used for the
    # FastSoftmax normalization (approx_recip=True).
    np.testing.assert_allclose(np.asarray(out), np.asarray(ref),
                               rtol=5e-3, atol=5e-3)

    print("KERNEL_OK")
</pallas_src>

<mosaic_0001>
module attributes {stable_mosaic.version = 11 : i64} {
  func.func @cv_nn_special_kernel(%arg0: i32, %arg1: memref<16x256xf32, #tpu.memory_space<vmem>>, %arg2: memref<352x16xf32, #tpu.memory_space<vmem>>, %arg3: memref<4x32x32xf32, #tpu.memory_space<vmem>>, %arg4: memref<544x1xf32, #tpu.memory_space<vmem>>, %arg5: memref<1x256xf32, #tpu.memory_space<vmem>>) attributes {dimension_semantics = [#tpu.dimension_semantics<parallel>], iteration_bounds = array<i64: 1>, scalar_prefetch = 0 : i64, scratch_operands = 0 : i64, tpu.core_type = #tpu.core_type<tc>, window_params = [{transform_indices = @transform_0, window_bounds = array<i64: 16, 256>}, {pipeline_mode = #tpu.pipeline_mode<synchronous>, transform_indices = @transform_1, window_bounds = array<i64: 352, 16>}, {pipeline_mode = #tpu.pipeline_mode<synchronous>, transform_indices = @transform_2, window_bounds = array<i64: 4, 32, 32>}, {pipeline_mode = #tpu.pipeline_mode<synchronous>, transform_indices = @transform_3, window_bounds = array<i64: 544, 1>}, {transform_indices = @transform_4, window_bounds = array<i64: 1, 256>}]} {
    %c0 = arith.constant 0 : index
    %c0_0 = arith.constant 0 : index
    %0 = vector.load %arg4[%c0, %c0_0] : memref<544x1xf32, #tpu.memory_space<vmem>>, vector<16x1xf32>
    %c16 = arith.constant 16 : index
    %c0_1 = arith.constant 0 : index
    %1 = vector.load %arg4[%c16, %c0_1] : memref<544x1xf32, #tpu.memory_space<vmem>>, vector<16x1xf32>
    %c32 = arith.constant 32 : index
    %c0_2 = arith.constant 0 : index
    %2 = vector.load %arg4[%c32, %c0_2] : memref<544x1xf32, #tpu.memory_space<vmem>>, vector<352x1xf32>
    %c384 = arith.constant 384 : index
    %c0_3 = arith.constant 0 : index
    %3 = vector.load %arg4[%c384, %c0_3] : memref<544x1xf32, #tpu.memory_space<vmem>>, vector<128x1xf32>
    %c512 = arith.constant 512 : index
    %c0_4 = arith.constant 0 : index
    %4 = vector.load %arg4[%c512, %c0_4] : memref<544x1xf32, #tpu.memory_space<vmem>>, vector<32x1xf32>
    %c0_5 = arith.constant 0 : index
    %c0_6 = arith.constant 0 : index
    %5 = vector.load %arg1[%c0_5, %c0_6] : memref<16x256xf32, #tpu.memory_space<vmem>>, vector<16x256xf32>
    %6 = vector.broadcast %0 : vector<16x1xf32> to vector<16x256xf32>
    %7 = arith.mulf %5, %6 : vector<16x256xf32>
    %8 = vector.broadcast %1 : vector<16x1xf32> to vector<16x256xf32>
    %9 = arith.addf %7, %8 : vector<16x256xf32>
    %c0_7 = arith.constant 0 : index
    %c0_8 = arith.constant 0 : index
    %10 = vector.load %arg2[%c0_7, %c0_8] : memref<352x16xf32, #tpu.memory_space<vmem>>, vector<352x16xf32>
    %cst = arith.constant dense<0.000000e+00> : vector<352x256xf32>
    %11 = tpu.matmul %10, %9, %cst {dimension_numbers = #tpu.dot_dimension_numbers<[1], [0], [0], [1], [0, 0, 1, 1], [], []>} : vector<352x16xf32>, vector<16x256xf32>, vector<352x256xf32> -> vector<352x256xf32>
    %12 = vector.broadcast %2 : vector<352x1xf32> to vector<352x256xf32>
    %13 = arith.addf %11, %12 : vector<352x256xf32>
    %14 = math.tanh %13 : vector<352x256xf32>
    %15 = vector.extract_strided_slice %14 {offsets = [0, 0], sizes = [32, 256], strides = [1, 1]} : vector<352x256xf32> to vector<32x256xf32>
    %16 = vector.extract_strided_slice %14 {offsets = [32, 0], sizes = [32, 256], strides = [1, 1]} : vector<352x256xf32> to vector<32x256xf32>
    %17 = vector.extract_strided_slice %14 {offsets = [64, 0], sizes = [32, 256], strides = [1, 1]} : vector<352x256xf32> to vector<32x256xf32>
    %18 = arith.mulf %15, %16 : vector<32x256xf32>
    %19 = math.absf %18 : vector<32x256xf32>
    %cst_9 = arith.constant dense<0.000000e+00> : vector<256xf32>
    %20 = vector.multi_reduction <add>, %19, %cst_9 [0] : vector<32x256xf32> to vector<256xf32>
    %21 = vector.shape_cast %20 : vector<256xf32> to vector<1x256xf32>
    %cst_10 = arith.constant 1.000000e-30 : f32
    %22 = vector.broadcast %cst_10 : f32 to vector<1x256xf32>
    %23 = arith.maximumf %21, %22 : vector<1x256xf32>
    %24 = tpu.reciprocal %23 {approx = true} : vector<1x256xf32> -> vector<1x256xf32>
    %25 = vector.broadcast %24 : vector<1x256xf32> to vector<32x256xf32>
    %26 = arith.mulf %19, %25 : vector<32x256xf32>
    %27 = arith.mulf %26, %17 : vector<32x256xf32>
    %28 = math.tanh %27 : vector<32x256xf32>
    %29 = vector.extract_strided_slice %14 {offsets = [96, 0], sizes = [32, 256], strides = [1, 1]} : vector<352x256xf32> to vector<32x256xf32>
    %30 = vector.extract_strided_slice %14 {offsets = [128, 0], sizes = [32, 256], strides = [1, 1]} : vector<352x256xf32> to vector<32x256xf32>
    %c0_11 = arith.constant 0 : index
    %c0_12 = arith.constant 0 : index
    %c0_13 = arith.constant 0 : index
    %31 = vector.load %arg3[%c0_11, %c0_12, %c0_13] : memref<4x32x32xf32, #tpu.memory_space<vmem>>, vector<1x32x32xf32>
    %32 = vector.shape_cast %31 : vector<1x32x32xf32> to vector<32x32xf32>
    %cst_14 = arith.constant dense<0.000000e+00> : vector<32x256xf32>
    %33 = tpu.matmul %32, %28, %cst_14 {dimension_numbers = #tpu.dot_dimension_numbers<[1], [0], [0], [1], [0, 0, 1, 1], [], []>} : vector<32x32xf32>, vector<32x256xf32>, vector<32x256xf32> -> vector<32x256xf32>
    %34 = vector.extract_strided_slice %3 {offsets = [0, 0], sizes = [32, 1], strides = [1, 1]} : vector<128x1xf32> to vector<32x1xf32>
    %35 = vector.broadcast %34 : vector<32x1xf32> to vector<32x256xf32>
    %36 = arith.addf %33, %35 : vector<32x256xf32>
    %37 = math.tanh %36 : vector<32x256xf32>
    %38 = arith.mulf %37, %29 : vector<32x256xf32>
    %39 = math.absf %38 : vector<32x256xf32>
    %cst_15 = arith.constant dense<0.000000e+00> : vector<256xf32>
    %40 = vector.multi_reduction <add>, %39, %cst_15 [0] : vector<32x256xf32> to vector<256xf32>
    %41 = vector.shape_cast %40 : vector<256xf32> to vector<1x256xf32>
    %cst_16 = arith.constant 1.000000e-30 : f32
    %42 = vector.broadcast %cst_16 : f32 to vector<1x256xf32>
    %43 = arith.maximumf %41, %42 : vector<1x256xf32>
    %44 = tpu.reciprocal %43 {approx = true} : vector<1x256xf32> -> vector<1x256xf32>
    %45 = vector.broadcast %44 : vector<1x256xf32> to vector<32x256xf32>
    %46 = arith.mulf %39, %45 : vector<32x256xf32>
    %47 = arith.mulf %46, %30 : vector<32x256xf32>
    %48 = math.tanh %47 : vector<32x256xf32>
    %49 = arith.addf %28, %48 : vector<32x256xf32>
    %50 = vector.extract_strided_slice %14 {offsets = [160, 0], sizes = [32, 256], strides = [1, 1]} : vector<352x256xf32> to vector<32x256xf32>
    %51 = vector.extract_strided_slice %14 {offsets = [192, 0], sizes = [32, 256], strides = [1, 1]} : vector<352x256xf32> to vector<32x256xf32>
    %c1 = arith.constant 1 : index
    %c0_17 = arith.constant 0 : index
    %c0_18 = arith.constant 0 : index
    %52 = vector.load %arg3[%c1, %c0_17, %c0_18] : memref<4x32x32xf32, #tpu.memory_space<vmem>>, vector<1x32x32xf32>
    %53 = vector.shape_cast %52 : vector<1x32x32xf32> to vector<32x32xf32>
    %cst_19 = arith.constant dense<0.000000e+00> : vector<32x256xf32>
    %54 = tpu.matmul %53, %49, %cst_19 {dimension_numbers = #tpu.dot_dimension_numbers<[1], [0], [0], [1], [0, 0, 1, 1], [], []>} : vector<32x32xf32>, vector<32x256xf32>, vector<32x256xf32> -> vector<32x256xf32>
    %55 = vector.extract_strided_slice %3 {offsets = [32, 0], sizes = [32, 1], strides = [1, 1]} : vector<128x1xf32> to vector<32x1xf32>
    %56 = vector.broadcast %55 : vector<32x1xf32> to vector<32x256xf32>
    %57 = arith.addf %54, %56 : vector<32x256xf32>
    %58 = math.tanh %57 : vector<32x256xf32>
    %59 = arith.mulf %58, %50 : vector<32x256xf32>
    %60 = math.absf %59 : vector<32x256xf32>
    %cst_20 = arith.constant dense<0.000000e+00> : vector<256xf32>
    %61 = vector.multi_reduction <add>, %60, %cst_20 [0] : vector<32x256xf32> to vector<256xf32>
    %62 = vector.shape_cast %61 : vector<256xf32> to vector<1x256xf32>
    %cst_21 = arith.constant 1.000000e-30 : f32
    %63 = vector.broadcast %cst_21 : f32 to vector<1x256xf32>
    %64 = arith.maximumf %62, %63 : vector<1x256xf32>
    %65 = tpu.reciprocal %64 {approx = true} : vector<1x256xf32> -> vector<1x256xf32>
    %66 = vector.broadcast %65 : vector<1x256xf32> to vector<32x256xf32>
    %67 = arith.mulf %60, %66 : vector<32x256xf32>
    %68 = arith.mulf %67, %51 : vector<32x256xf32>
    %69 = math.tanh %68 : vector<32x256xf32>
    %70 = arith.addf %49, %69 : vector<32x256xf32>
    %71 = vector.extract_strided_slice %14 {offsets = [224, 0], sizes = [32, 256], strides = [1, 1]} : vector<352x256xf32> to vector<32x256xf32>
    %72 = vector.extract_strided_slice %14 {offsets = [256, 0], sizes = [32, 256], strides = [1, 1]} : vector<352x256xf32> to vector<32x256xf32>
    %c2 = arith.constant 2 : index
    %c0_22 = arith.constant 0 : index
    %c0_23 = arith.constant 0 : index
    %73 = vector.load %arg3[%c2, %c0_22, %c0_23] : memref<4x32x32xf32, #tpu.memory_space<vmem>>, vector<1x32x32xf32>
    %74 = vector.shape_cast %73 : vector<1x32x32xf32> to vector<32x32xf32>
    %cst_24 = arith.constant dense<0.000000e+00> : vector<32x256xf32>
    %75 = tpu.matmul %74, %70, %cst_24 {dimension_numbers = #tpu.dot_dimension_numbers<[1], [0], [0], [1], [0, 0, 1, 1], [], []>} : vector<32x32xf32>, vector<32x256xf32>, vector<32x256xf32> -> vector<32x256xf32>
    %76 = vector.extract_strided_slice %3 {offsets = [64, 0], sizes = [32, 1], strides = [1, 1]} : vector<128x1xf32> to vector<32x1xf32>
    %77 = vector.broadcast %76 : vector<32x1xf32> to vector<32x256xf32>
    %78 = arith.addf %75, %77 : vector<32x256xf32>
    %79 = math.tanh %78 : vector<32x256xf32>
    %80 = arith.mulf %79, %71 : vector<32x256xf32>
    %81 = math.absf %80 : vector<32x256xf32>
    %cst_25 = arith.constant dense<0.000000e+00> : vector<256xf32>
    %82 = vector.multi_reduction <add>, %81, %cst_25 [0] : vector<32x256xf32> to vector<256xf32>
    %83 = vector.shape_cast %82 : vector<256xf32> to vector<1x256xf32>
    %cst_26 = arith.constant 1.000000e-30 : f32
    %84 = vector.broadcast %cst_26 : f32 to vector<1x256xf32>
    %85 = arith.maximumf %83, %84 : vector<1x256xf32>
    %86 = tpu.reciprocal %85 {approx = true} : vector<1x256xf32> -> vector<1x256xf32>
    %87 = vector.broadcast %86 : vector<1x256xf32> to vector<32x256xf32>
    %88 = arith.mulf %81, %87 : vector<32x256xf32>
    %89 = arith.mulf %88, %72 : vector<32x256xf32>
    %90 = math.tanh %89 : vector<32x256xf32>
    %91 = arith.addf %70, %90 : vector<32x256xf32>
    %92 = vector.extract_strided_slice %14 {offsets = [288, 0], sizes = [32, 256], strides = [1, 1]} : vector<352x256xf32> to vector<32x256xf32>
    %93 = vector.extract_strided_slice %14 {offsets = [320, 0], sizes = [32, 256], strides = [1, 1]} : vector<352x256xf32> to vector<32x256xf32>
    %c3 = arith.constant 3 : index
    %c0_27 = arith.constant 0 : index
    %c0_28 = arith.constant 0 : index
    %94 = vector.load %arg3[%c3, %c0_27, %c0_28] : memref<4x32x32xf32, #tpu.memory_space<vmem>>, vector<1x32x32xf32>
    %95 = vector.shape_cast %94 : vector<1x32x32xf32> to vector<32x32xf32>
    %cst_29 = arith.constant dense<0.000000e+00> : vector<32x256xf32>
    %96 = tpu.matmul %95, %91, %cst_29 {dimension_numbers = #tpu.dot_dimension_numbers<[1], [0], [0], [1], [0, 0, 1, 1], [], []>} : vector<32x32xf32>, vector<32x256xf32>, vector<32x256xf32> -> vector<32x256xf32>
    %97 = vector.extract_strided_slice %3 {offsets = [96, 0], sizes = [32, 1], strides = [1, 1]} : vector<128x1xf32> to vector<32x1xf32>
    %98 = vector.broadcast %97 : vector<32x1xf32> to vector<32x256xf32>
    %99 = arith.addf %96, %98 : vector<32x256xf32>
    %100 = math.tanh %99 : vector<32x256xf32>
    %101 = arith.mulf %100, %92 : vector<32x256xf32>
    %102 = math.absf %101 : vector<32x256xf32>
    %cst_30 = arith.constant dense<0.000000e+00> : vector<256xf32>
    %103 = vector.multi_reduction <add>, %102, %cst_30 [0] : vector<32x256xf32> to vector<256xf32>
    %104 = vector.shape_cast %103 : vector<256xf32> to vector<1x256xf32>
    %cst_31 = arith.constant 1.000000e-30 : f32
    %105 = vector.broadcast %cst_31 : f32 to vector<1x256xf32>
    %106 = arith.maximumf %104, %105 : vector<1x256xf32>
    %107 = tpu.reciprocal %106 {approx = true} : vector<1x256xf32> -> vector<1x256xf32>
    %108 = vector.broadcast %107 : vector<1x256xf32> to vector<32x256xf32>
    %109 = arith.mulf %102, %108 : vector<32x256xf32>
    %110 = arith.mulf %109, %93 : vector<32x256xf32>
    %111 = math.tanh %110 : vector<32x256xf32>
    %112 = arith.addf %91, %111 : vector<32x256xf32>
    %113 = vector.broadcast %4 : vector<32x1xf32> to vector<32x256xf32>
    %114 = arith.mulf %112, %113 : vector<32x256xf32>
    %cst_32 = arith.constant dense<0.000000e+00> : vector<256xf32>
    %115 = vector.multi_reduction <add>, %114, %cst_32 [0] : vector<32x256xf32> to vector<256xf32>
    %116 = vector.shape_cast %115 : vector<256xf32> to vector<1x256xf32>
    %c0_33 = arith.constant 0 : index
    %c0_34 = arith.constant 0 : index
    %117 = vector.load %arg5[%c0_33, %c0_34] : memref<1x256xf32, #tpu.memory_space<vmem>>, vector<1x256xf32>
    tpu.vector_store %arg5[%c0_33, %c0_34], %116 {strides = array<i32>} : memref<1x256xf32, #tpu.memory_space<vmem>>, vector<1x256xf32>,
    return
  }
  func.func @transform_0(%arg0: i32) -> (i32, i32) {
    %c0_i32 = arith.constant 0 : i32
    %c0_i32_0 = arith.constant 0 : i32
    return %c0_i32, %arg0 : i32, i32
  }
  func.func @transform_1(%arg0: i32) -> (i32, i32) {
    %c0_i32 = arith.constant 0 : i32
    %c0_i32_0 = arith.constant 0 : i32
    %c0_i32_1 = arith.constant 0 : i32
    return %c0_i32, %c0_i32_0 : i32, i32
  }
  func.func @transform_2(%arg0: i32) -> (i32, i32, i32) {
    %c0_i32 = arith.constant 0 : i32
    %c0_i32_0 = arith.constant 0 : i32
    %c0_i32_1 = arith.constant 0 : i32
    %c0_i32_2 = arith.constant 0 : i32
    return %c0_i32, %c0_i32_0, %c0_i32_1 : i32, i32, i32
  }
  func.func @transform_3(%arg0: i32) -> (i32, i32) {
    %c0_i32 = arith.constant 0 : i32
    %c0_i32_0 = arith.constant 0 : i32
    %c0_i32_1 = arith.constant 0 : i32
    return %c0_i32, %c0_i32_0 : i32, i32
  }
  func.func @transform_4(%arg0: i32) -> (i32, i32) {
    %c0_i32 = arith.constant 0 : i32
    %c0_i32_0 = arith.constant 0 : i32
    return %c0_i32, %arg0 : i32, i32
  }
}

</mosaic_0001>

<bundles_post_ra>
// kernel: tpu_custom_call.1
= control target key start
LH: loop header
LB: loop body
LE: loop exit
PB: predicated region body
PF: predicated region fallthrough
CT: control target
= control target key end

     0   :  { %v2373_v2 = vmov 0   ;;  %v3450_v11 = vmov 0.0   ;;  %s3445_s0 = inlined_call_operand.vmem [shape: f32[16,256], index: 0, kind: input, shape index: {}]   ;;  %s3446_s1 = inlined_call_operand.vmem [shape: f32[352,16], index: 1, kind: input, shape index: {}]   ;;  %s3447_s2 = inlined_call_operand.vmem [shape: f32[4,32,32], index: 2, kind: input, shape index: {}]   ;;  %s3448_s3 = inlined_call_operand.vmem [shape: f32[544,1], index: 3, kind: input, shape index: {}]   ;;  %s3449_s4 = inlined_call_operand.hbm [shape: f32[1,256], index: 4, kind: output, shape index: {}]  }
   0x1   :  { %v20_v0 = vld [vmem:[%s3448_s3 + $0x10] sm:$0xff]  ;;  %v18_v1 = vld [vmem:[%s3448_s3] sm:$0xff]  ;;  %2008 = vset.pattern.permute.xlu1 %v2373_v2  ;;  %2007 = vset.pattern.permute.xlu0 %v2373_v2  ;;  %v21_v3 = vld [vmem:[%s3448_s3 + $0x18] sm:$0xff] }
   0x2   :  { %106 = vperm.xlu1 %2008, %v20_v0   ;;  %92 = vperm.xlu0 %2007, %v18_v1   ;;  %v19_v4 = vld [vmem:[%s3448_s3 + $0x8] sm:$0xff]  ;;  %v22_v6 = vld [vmem:[%s3448_s3 + $0x20] sm:$0xff]  ;;  %v28_v9 = vld [vmem:[%s3448_s3 + $0x50] sm:$0xff] }
   0x3   :  { %v23_v5 = vld [vmem:[%s3448_s3 + $0x28] sm:$0xff]  ;;  %v26_v8 = vld [vmem:[%s3448_s3 + $0x40] sm:$0xff]  ;;  %v24_v10 = vld [vmem:[%s3448_s3 + $0x30] sm:$0xff]  ;;  %579 = vmatprep.mubr.f32.mxu0 %v3450_v11  ;;  %759 = vmatprep.mubr.f32.mxu1 %v3450_v11 }
   0x4   :  { %v27_v7 = vld [vmem:[%s3448_s3 + $0x48] sm:$0xff]  ;;  %v29_v12 = vld [vmem:[%s3448_s3 + $0x58] sm:$0xff]  ;;  %v30_v15 = vld [vmem:[%s3448_s3 + $0x60] sm:$0xff] }
   0x5   :  { %v25_v13 = vld [vmem:[%s3448_s3 + $0x38] sm:$0xff]  ;;  %v31_v14 = vld [vmem:[%s3448_s3 + $0x68] sm:$0xff] }
   0x6   :  { %111 = vperm.xlu1 %2008, %v21_v3   ;;  %97 = vperm.xlu0 %2007, %v19_v4  }
   0xa   :  { %169 = vperm.xlu1 %2008, %v23_v5   ;;  %164 = vperm.xlu0 %2007, %v22_v6  }
   0xe   :  { %189 = vperm.xlu1 %2008, %v27_v7   ;;  %184 = vperm.xlu0 %2007, %v26_v8  }
  0x12   :  { %194 = vperm.xlu1 %2008, %v28_v9   ;;  %174 = vperm.xlu0 %2007, %v24_v10  }
  0x16   :  { %199 = vperm.xlu1 %2008, %v29_v12   ;;  %179 = vperm.xlu0 %2007, %v25_v13  }
  0x1a   :  { %209 = vperm.xlu1 %2008, %v31_v14   ;;  %204 = vperm.xlu0 %2007, %v30_v15  }
  0x1b   :  { %9 = vsyncpa [#allocation3], 0  ;;  %v33_v16 = vld [vmem:[%s3448_s3 + $0x78] sm:$0xff]  ;;  %v32_v17 = vld [vmem:[%s3448_s3 + $0x70] sm:$0xff]  ;;  %vm382_vm0 = vcmask 130048   ;;  %vm1018_vm1 = vcmask 261120  }
  0x1c   :  { %v35_v18 = vld [vmem:[%s3448_s3 + $0x88] sm:$0xff]  ;;  %v34_v19 = vld [vmem:[%s3448_s3 + $0x80] sm:$0xff]  ;;  %v68_v22 = vld [vmem:[%s3448_s3 + $0x190] sm:$0xff] }
  0x1d   :  { %v67_v20 = vld [vmem:[%s3448_s3 + $0x188] sm:$0xff]  ;;  %v66_v21 = vld [vmem:[%s3448_s3 + $0x180] sm:$0xff]  ;;  %v36_v23 = vld [vmem:[%s3448_s3 + $0x90] sm:$0xff] }
  0x1e   :  { %219 = vperm.xlu1 %2008, %v33_v16   ;;  %214 = vperm.xlu0 %2007, %v32_v17   ;;  %v69_v24 = vld [vmem:[%s3448_s3 + $0x198] sm:$0xff]  ;;  %v39_v26 = vld [vmem:[%s3448_s3 + $0xa8] sm:$0xff]  ;;  %v38_v27 = vld [vmem:[%s3448_s3 + $0xa0] sm:$0xff] }
  0x1f   :  { %v37_v25 = vld [vmem:[%s3448_s3 + $0x98] sm:$0xff]  ;;  %v40_v29 = vld [vmem:[%s3448_s3 + $0xb0] sm:$0xff]  ;;  %v43_v30 = vld [vmem:[%s3448_s3 + $0xc8] sm:$0xff] }
  0x20   :  { %v41_v28 = vld [vmem:[%s3448_s3 + $0xb8] sm:$0xff]  ;;  %v42_v31 = vld [vmem:[%s3448_s3 + $0xc0] sm:$0xff]  ;;  %v71_v32 = vld [vmem:[%s3448_s3 + $0x1a8] sm:$0xff] }
  0x21   :  { %v70_v33 = vld [vmem:[%s3448_s3 + $0x1a0] sm:$0xff]  ;;  %v72_v34 = vld [vmem:[%s3448_s3 + $0x1b0] sm:$0xff]  ;;  %v73_v36 = vld [vmem:[%s3448_s3 + $0x1b8] sm:$0xff] }
  0x22   :  { %229 = vperm.xlu1 %2008, %v35_v18   ;;  %224 = vperm.xlu0 %2007, %v34_v19   ;;  %v44_v35 = vld [vmem:[%s3448_s3 + $0xd0] sm:$0xff]  ;;  %v45_v37 = vld [vmem:[%s3448_s3 + $0xd8] sm:$0xff]  ;;  %v47_v38 = vld [vmem:[%s3448_s3 + $0xe8] sm:$0xff] }
  0x23   :  { %v46_v39 = vld [vmem:[%s3448_s3 + $0xe0] sm:$0xff]  ;;  %v49_v40 = vld [vmem:[%s3448_s3 + $0xf8] sm:$0xff]  ;;  %v48_v41 = vld [vmem:[%s3448_s3 + $0xf0] sm:$0xff] }
  0x24   :  { %v51_v42 = vld [vmem:[%s3448_s3 + $0x108] sm:$0xff]  ;;  %v50_v43 = vld [vmem:[%s3448_s3 + $0x100] sm:$0xff]  ;;  %v76_v46 = vld [vmem:[%s3448_s3 + $0x1d0] sm:$0xff] }
  0x25   :  { %v75_v44 = vld [vmem:[%s3448_s3 + $0x1c8] sm:$0xff]  ;;  %v74_v45 = vld [vmem:[%s3448_s3 + $0x1c0] sm:$0xff]  ;;  %v52_v47 = vld [vmem:[%s3448_s3 + $0x110] sm:$0xff] }
  0x26   :  { %1005 = vperm.xlu1 %2008, %v67_v20   ;;  %1000 = vperm.xlu0 %2007, %v66_v21   ;;  %v77_v48 = vld [vmem:[%s3448_s3 + $0x1d8] sm:$0xff]  ;;  %v55_v50 = vld [vmem:[%s3448_s3 + $0x128] sm:$0xff]  ;;  %v54_v51 = vld [vmem:[%s3448_s3 + $0x120] sm:$0xff] }
  0x27   :  { %v53_v49 = vld [vmem:[%s3448_s3 + $0x118] sm:$0xff]  ;;  %v56_v53 = vld [vmem:[%s3448_s3 + $0x130] sm:$0xff]  ;;  %v59_v54 = vld [vmem:[%s3448_s3 + $0x148] sm:$0xff] }
  0x28   :  { %v57_v52 = vld [vmem:[%s3448_s3 + $0x138] sm:$0xff]  ;;  %v58_v55 = vld [vmem:[%s3448_s3 + $0x140] sm:$0xff]  ;;  %v79_v56 = vld [vmem:[%s3448_s3 + $0x1e8] sm:$0xff] }
  0x29   :  { %v78_v57 = vld [vmem:[%s3448_s3 + $0x1e0] sm:$0xff]  ;;  %v80_v58 = vld [vmem:[%s3448_s3 + $0x1f0] sm:$0xff]  ;;  %v81_v60 = vld [vmem:[%s3448_s3 + $0x1f8] sm:$0xff] }
  0x2a   :  { %1010 = vperm.xlu1 %2008, %v68_v22   ;;  %234 = vperm.xlu0 %2007, %v36_v23   ;;  %v60_v59 = vld [vmem:[%s3448_s3 + $0x150] sm:$0xff]  ;;  %v61_v61 = vld [vmem:[%s3448_s3 + $0x158] sm:$0xff]  ;;  %v63_v62 = vld [vmem:[%s3448_s3 + $0x168] sm:$0xff] }
  0x2b   :  { %v62_v63 = vld [vmem:[%s3448_s3 + $0x160] sm:$0xff]  ;;  %v65_v0 = vld [vmem:[%s3448_s3 + $0x178] sm:$0xff]  ;;  %v64_v1 = vld [vmem:[%s3448_s3 + $0x170] sm:$0xff] }
  0x2c   :  { %v83_v2 = vld [vmem:[%s3448_s3 + $0x208] sm:$0xff]  ;;  %v82_v3 = vld [vmem:[%s3448_s3 + $0x200] sm:$0xff]  ;;  %v88_v8 = vld [vmem:[%s3445_s0 + $0x10] sm:$0xff] }
  0x2d   :  { %v86_v5 = vld [vmem:[%s3445_s0] sm:$0xff]  ;;  %v87_v6 = vld [vmem:[%s3445_s0 + $0x8] sm:$0xff]  ;;  %v89_v9 = vld [vmem:[%s3445_s0 + $0x18] sm:$0xff] }
  0x2e   :  { %1015 = vperm.xlu1 %2008, %v69_v24   ;;  %239 = vperm.xlu0 %2007, %v37_v25   ;;  %v85_v10 = vld [vmem:[%s3448_s3 + $0x218] sm:$0xff]  ;;  %v84_v12 = vld [vmem:[%s3448_s3 + $0x210] sm:$0xff]  ;;  %v118_v25 = vld [vmem:[%s3446_s1] sm:$0xff] }
  0x32   :  { %249 = vperm.xlu1 %2008, %v39_v26   ;;  %244 = vperm.xlu0 %2007, %v38_v27   ;;  %v148_v26 = vld [vmem:[%s3446_s1 + $0xf0] sm:$0xff]  ;;  %v119_v27 = vld [vmem:[%s3446_s1 + $0x8] sm:$0xff] }
  0x36   :  { %259 = vperm.xlu1 %2008, %v41_v28   ;;  %254 = vperm.xlu0 %2007, %v40_v29   ;;  %v149_v28 = vld [vmem:[%s3446_s1 + $0xf8] sm:$0xff]  ;;  %v120_v29 = vld [vmem:[%s3446_s1 + $0x10] sm:$0xff] }
  0x3a   :  { %269 = vperm.xlu1 %2008, %v43_v30   ;;  %264 = vperm.xlu0 %2007, %v42_v31   ;;  %v150_v30 = vld [vmem:[%s3446_s1 + $0x100] sm:$0xff]  ;;  %v121_v31 = vld [vmem:[%s3446_s1 + $0x18] sm:$0xff] }
  0x3e   :  { %1210 = vperm.xlu1 %2008, %v71_v32   ;;  %1205 = vperm.xlu0 %2007, %v70_v33   ;;  %v151_v32 = vld [vmem:[%s3446_s1 + $0x108] sm:$0xff]  ;;  %v122_v33 = vld [vmem:[%s3446_s1 + $0x20] sm:$0xff] }
  0x42   :  { %1215 = vperm.xlu1 %2008, %v72_v34   ;;  %274 = vperm.xlu0 %2007, %v44_v35   ;;  %v152_v34 = vld [vmem:[%s3446_s1 + $0x110] sm:$0xff]  ;;  %v123_v35 = vld [vmem:[%s3446_s1 + $0x28] sm:$0xff] }
  0x46   :  { %1220 = vperm.xlu1 %2008, %v73_v36   ;;  %279 = vperm.xlu0 %2007, %v45_v37   ;;  %v153_v36 = vld [vmem:[%s3446_s1 + $0x118] sm:$0xff]  ;;  %v124_v37 = vld [vmem:[%s3446_s1 + $0x30] sm:$0xff] }
  0x4a   :  { %289 = vperm.xlu1 %2008, %v47_v38   ;;  %284 = vperm.xlu0 %2007, %v46_v39   ;;  %v154_v38 = vld [vmem:[%s3446_s1 + $0x120] sm:$0xff]  ;;  %v125_v39 = vld [vmem:[%s3446_s1 + $0x38] sm:$0xff] }
  0x4e   :  { %299 = vperm.xlu1 %2008, %v49_v40   ;;  %294 = vperm.xlu0 %2007, %v48_v41   ;;  %v155_v40 = vld [vmem:[%s3446_s1 + $0x128] sm:$0xff]  ;;  %v126_v41 = vld [vmem:[%s3446_s1 + $0x40] sm:$0xff] }
  0x52   :  { %309 = vperm.xlu1 %2008, %v51_v42   ;;  %304 = vperm.xlu0 %2007, %v50_v43   ;;  %v156_v42 = vld [vmem:[%s3446_s1 + $0x130] sm:$0xff]  ;;  %v127_v43 = vld [vmem:[%s3446_s1 + $0x48] sm:$0xff] }
  0x56   :  { %1414 = vperm.xlu1 %2008, %v75_v44   ;;  %1409 = vperm.xlu0 %2007, %v74_v45   ;;  %v157_v44 = vld [vmem:[%s3446_s1 + $0x138] sm:$0xff]  ;;  %v128_v45 = vld [vmem:[%s3446_s1 + $0x50] sm:$0xff] }
  0x5a   :  { %1419 = vperm.xlu1 %2008, %v76_v46   ;;  %314 = vperm.xlu0 %2007, %v52_v47   ;;  %v158_v46 = vld [vmem:[%s3446_s1 + $0x140] sm:$0xff]  ;;  %v129_v47 = vld [vmem:[%s3446_s1 + $0x58] sm:$0xff] }
  0x5e   :  { %1424 = vperm.xlu1 %2008, %v77_v48   ;;  %319 = vperm.xlu0 %2007, %v53_v49   ;;  %v159_v48 = vld [vmem:[%s3446_s1 + $0x148] sm:$0xff]  ;;  %v130_v49 = vld [vmem:[%s3446_s1 + $0x60] sm:$0xff] }
  0x62   :  { %329 = vperm.xlu1 %2008, %v55_v50   ;;  %324 = vperm.xlu0 %2007, %v54_v51   ;;  %v160_v50 = vld [vmem:[%s3446_s1 + $0x150] sm:$0xff]  ;;  %v131_v51 = vld [vmem:[%s3446_s1 + $0x68] sm:$0xff] }
  0x66   :  { %339 = vperm.xlu1 %2008, %v57_v52   ;;  %334 = vperm.xlu0 %2007, %v56_v53   ;;  %v161_v52 = vld [vmem:[%s3446_s1 + $0x158] sm:$0xff]  ;;  %v132_v53 = vld [vmem:[%s3446_s1 + $0x70] sm:$0xff] }
  0x6a   :  { %349 = vperm.xlu1 %2008, %v59_v54   ;;  %344 = vperm.xlu0 %2007, %v58_v55   ;;  %v133_v54 = vld [vmem:[%s3446_s1 + $0x78] sm:$0xff]  ;;  %v134_v55 = vld [vmem:[%s3446_s1 + $0x80] sm:$0xff] }
  0x6e   :  { %1618 = vperm.xlu1 %2008, %v79_v56   ;;  %1613 = vperm.xlu0 %2007, %v78_v57   ;;  %v135_v56 = vld [vmem:[%s3446_s1 + $0x88] sm:$0xff]  ;;  %v136_v57 = vld [vmem:[%s3446_s1 + $0x90] sm:$0xff] }
  0x72   :  { %1623 = vperm.xlu1 %2008, %v80_v58   ;;  %354 = vperm.xlu0 %2007, %v60_v59   ;;  %v137_v58 = vld [vmem:[%s3446_s1 + $0x98] sm:$0xff]  ;;  %v138_v59 = vld [vmem:[%s3446_s1 + $0xa0] sm:$0xff] }
  0x76   :  { %1628 = vperm.xlu1 %2008, %v81_v60   ;;  %359 = vperm.xlu0 %2007, %v61_v61   ;;  %v139_v60 = vld [vmem:[%s3446_s1 + $0xa8] sm:$0xff]  ;;  %v140_v61 = vld [vmem:[%s3446_s1 + $0xb0] sm:$0xff] }
  0x7a   :  { %369 = vperm.xlu1 %2008, %v63_v62   ;;  %364 = vperm.xlu0 %2007, %v62_v63   ;;  %v141_v62 = vld [vmem:[%s3446_s1 + $0xb8] sm:$0xff]  ;;  %v142_v63 = vld [vmem:[%s3446_s1 + $0xc0] sm:$0xff] }
  0x7e   :  { %379 = vperm.xlu1 %2008, %v65_v0   ;;  %374 = vperm.xlu0 %2007, %v64_v1   ;;  %v143_v0 = vld [vmem:[%s3446_s1 + $0xc8] sm:$0xff]  ;;  %v144_v1 = vld [vmem:[%s3446_s1 + $0xd0] sm:$0xff] }
  0x81   :  { %v107_v4 = vpop.permute.xlu1 %106  ;;  %v93_v7 = vpop.permute.xlu0 %92 }
  0x82   :  { %1817 = vperm.xlu1 %2008, %v83_v2   ;;  %1812 = vperm.xlu0 %2007, %v82_v3   ;;  %v100_v13 = vmul.f32 %v93_v7, %v86_v5  ;;  %v101_v14 = vmul.f32 %v93_v7, %v87_v6  ;;  %v145_v2 = vld [vmem:[%s3446_s1 + $0xd8] sm:$0xff]  ;;  %v146_v3 = vld [vmem:[%s3446_s1 + $0xe0] sm:$0xff] }
  0x84   :  { %v115_v19 = vadd.f32 %v107_v4, %v101_v14  ;;  %v114_v21 = vadd.f32 %v107_v4, %v100_v13  ;;  %v147_v4 = vld [vmem:[%s3446_s1 + $0xe8] sm:$0xff] }
  0x85   :  { %v98_v15 = vpop.permute.xlu0 %97  ;;  %v112_v18 = vpop.permute.xlu1 %111 }
  0x86   :  { %v102_v16 = vmul.f32 %v98_v15, %v88_v8  ;;  %v103_v17 = vmul.f32 %v98_v15, %v89_v9  ;;  %1827 = vperm.xlu1 %2008, %v85_v10   ;;  %1822 = vperm.xlu0 %2007, %v84_v12  }
  0x88   :  { %v117_v20 = vadd.f32 %v112_v18, %v103_v17  ;;  %v116_v22 = vadd.f32 %v112_v18, %v102_v16 }
  0x89   :  { %v165_v5 = vpop.permute.xlu0 %164  ;;  %v170_v10 = vpop.permute.xlu1 %169 }
  0x8a   :  { %v1965_v23 = vpack.c.bf16 %v117_v20, %v115_v19  ;;  %v1967_v24 = vpack.c.bf16 %v116_v22, %v114_v21 }
  0x8c   :  { %1966 = vmatprep.subr.bf16.mxu0 %v1965_v23  ;;  %2001 = vmatprep.subr.bf16.mxu1 %v1965_v23 }
  0x8d   :  { %1968 = vmatpush1.bf16.msra.mxu0 %v1967_v24  ;;  %2002 = vmatpush1.bf16.msra.mxu1 %v1967_v24  ;;  %v185_v16 = vpop.permute.xlu0 %184  ;;  %v190_v21 = vpop.permute.xlu1 %189 }
  0x90   :  { %1893 = vmatmul.mubr.msk.f32.vlgmr.msra.gmra.mrb[0].mxu0 %vm382_vm0, %v118_v25  ;;  %1923 = vmatmul.mubr.msk.f32.vlgmr.msra.gmra.mrb[0].mxu1 %vm382_vm0, %v148_v26 }
  0x91   :  { %585 = vmatprep.mubr.f32.mxu0 %v3450_v11  ;;  %765 = vmatprep.mubr.f32.mxu1 %v3450_v11 }
  0x94   :  { %1894 = vmatmul.mubr.msk.f32.gmra.mrb[2].mxu0 %vm382_vm0, %v119_v27  ;;  %1924 = vmatmul.mubr.msk.f32.gmra.mrb[2].mxu1 %vm382_vm0, %v149_v28  ;;  %v175_v27 = vpop.permute.xlu0 %174 }
  0x95   :  { %591 = vmatprep.mubr.f32.mxu0 %v3450_v11  ;;  %771 = vmatprep.mubr.f32.mxu1 %v3450_v11 }
  0x98   :  { %1895 = vmatmul.mubr.msk.f32.gmra.mrb[4].mxu0 %vm382_vm0, %v120_v29  ;;  %1925 = vmatmul.mubr.msk.f32.gmra.mrb[4].mxu1 %vm382_vm0, %v150_v30 }
  0x99   :  { %597 = vmatprep.mubr.f32.mxu0 %v3450_v11  ;;  %777 = vmatprep.mubr.f32.mxu1 %v3450_v11 }
  0x9c   :  { %1896 = vmatmul.mubr.msk.f32.gmra.mrb[6].mxu0 %vm382_vm0, %v121_v31  ;;  %1926 = vmatmul.mubr.msk.f32.gmra.mrb[6].mxu1 %vm382_vm0, %v151_v32 }
  0x9d   :  { %603 = vmatprep.mubr.f32.mxu0 %v3450_v11  ;;  %783 = vmatprep.mubr.f32.mxu1 %v3450_v11 }
  0xa0   :  { %1897 = vmatmul.mubr.msk.f32.gmra.mrb[8].mxu0 %vm382_vm0, %v122_v33  ;;  %1927 = vmatmul.mubr.msk.f32.gmra.mrb[8].mxu1 %vm382_vm0, %v152_v34 }
  0xa1   :  { %609 = vmatprep.mubr.f32.mxu0 %v3450_v11  ;;  %789 = vmatprep.mubr.f32.mxu1 %v3450_v11 }
  0xa4   :  { %1898 = vmatmul.mubr.msk.f32.gmra.mrb[10].mxu0 %vm382_vm0, %v123_v35  ;;  %1928 = vmatmul.mubr.msk.f32.gmra.mrb[10].mxu1 %vm382_vm0, %v153_v36  ;;  %v195_v36 = vpop.permute.xlu1 %194 }
  0xa5   :  { %615 = vmatprep.mubr.f32.mxu0 %v3450_v11  ;;  %795 = vmatprep.mubr.f32.mxu1 %v3450_v11 }
  0xa8   :  { %1899 = vmatmul.mubr.msk.f32.gmra.mrb[12].mxu0 %vm382_vm0, %v124_v37  ;;  %1929 = vmatmul.mubr.msk.f32.gmra.mrb[12].mxu1 %vm382_vm0, %v154_v38 }
  0xa9   :  { %621 = vmatprep.mubr.f32.mxu0 %v3450_v11  ;;  %801 = vmatprep.mubr.f32.mxu1 %v3450_v11 }
  0xac   :  { %1900 = vmatmul.mubr.msk.f32.gmra.mrb[14].mxu0 %vm382_vm0, %v125_v39  ;;  %1930 = vmatmul.mubr.msk.f32.gmra.mrb[14].mxu1 %vm382_vm0, %v155_v40 }
  0xad   :  { %627 = vmatprep.mubr.f32.mxu0 %v3450_v11  ;;  %807 = vmatprep.mubr.f32.mxu1 %v3450_v11 }
  0xb0   :  { %1901 = vmatmul.mubr.msk.f32.gmra.mrb[16].mxu0 %vm382_vm0, %v126_v41  ;;  %1931 = vmatmul.mubr.msk.f32.gmra.mrb[16].mxu1 %vm382_vm0, %v156_v42 }
  0xb1   :  { %633 = vmatprep.mubr.f32.mxu0 %v3450_v11  ;;  %813 = vmatprep.mubr.f32.mxu1 %v3450_v11 }
  0xb4   :  { %1902 = vmatmul.mubr.msk.f32.gmra.mrb[18].mxu0 %vm382_vm0, %v127_v43  ;;  %1932 = vmatmul.mubr.msk.f32.gmra.mrb[18].mxu1 %vm382_vm0, %v157_v44 }
  0xb5   :  { %639 = vmatprep.mubr.f32.mxu0 %v3450_v11  ;;  %819 = vmatprep.mubr.f32.mxu1 %v3450_v11 }
  0xb8   :  { %1903 = vmatmul.mubr.msk.f32.gmra.mrb[20].mxu0 %vm382_vm0, %v128_v45  ;;  %1933 = vmatmul.mubr.msk.f32.gmra.mrb[20].mxu1 %vm382_vm0, %v158_v46  ;;  %v180_v45 = vpop.permute.xlu0 %179 }
  0xb9   :  { %645 = vmatprep.mubr.f32.mxu0 %v3450_v11  ;;  %825 = vmatprep.mubr.f32.mxu1 %v3450_v11 }
  0xbc   :  { %1904 = vmatmul.mubr.msk.f32.gmra.mrb[22].mxu0 %vm382_vm0, %v129_v47  ;;  %1934 = vmatmul.mubr.msk.f32.gmra.mrb[22].mxu1 %vm382_vm0, %v159_v48 }
  0xbd   :  { %651 = vmatprep.mubr.f32.mxu0 %v3450_v11  ;;  %831 = vmatprep.mubr.f32.mxu1 %v3450_v11 }
  0xc0   :  { %1905 = vmatmul.mubr.msk.f32.gmra.mrb[24].mxu0 %vm382_vm0, %v130_v49  ;;  %1935 = vmatmul.mubr.msk.f32.gmra.mrb[24].mxu1 %vm382_vm0, %v160_v50 }
  0xc1   :  { %657 = vmatprep.mubr.f32.mxu0 %v3450_v11  ;;  %837 = vmatprep.mubr.f32.mxu1 %v3450_v11 }
  0xc4   :  { %1906 = vmatmul.mubr.msk.f32.gmra.mrb[26].mxu0 %vm382_vm0, %v131_v51  ;;  %1936 = vmatmul.mubr.msk.f32.gmra.mrb[26].mxu1 %vm382_vm0, %v161_v52 }
  0xc5   :  { %663 = vmatprep.mubr.f32.mxu0 %v3450_v11  ;;  %1095 = vmatprep.mubr.f32.mxu1 %v3450_v11 }
  0xc8   :  { %1907 = vmatmul.mubr.msk.f32.gmra.mrb[28].mxu0 %vm382_vm0, %v132_v53 }
  0xc9   :  { %669 = vmatprep.mubr.f32.mxu0 %v3450_v11 }
  0xcc   :  { %1908 = vmatmul.mubr.msk.f32.gmra.mrb[30].mxu0 %vm382_vm0, %v133_v54  ;;  %v200_v54 = vpop.permute.xlu1 %199 }
  0xcd   :  { %675 = vmatprep.mubr.f32.mxu0 %v3450_v11 }
  0xd0   :  { %1909 = vmatmul.mubr.msk.f32.gmra.mrb[32].mxu0 %vm382_vm0, %v134_v55 }
  0xd1   :  { %681 = vmatprep.mubr.f32.mxu0 %v3450_v11 }
  0xd4   :  { %1910 = vmatmul.mubr.msk.f32.gmra.mrb[34].mxu0 %vm382_vm0, %v135_v56 }
  0xd5   :  { %687 = vmatprep.mubr.f32.mxu0 %v3450_v11 }
  0xd8   :  { %1911 = vmatmul.mubr.msk.f32.gmra.mrb[36].mxu0 %vm382_vm0, %v136_v57 }
  0xd9   :  { %693 = vmatprep.mubr.f32.mxu0 %v3450_v11 }
  0xdc   :  { %1912 = vmatmul.mubr.msk.f32.gmra.mrb[38].mxu0 %vm382_vm0, %v137_v58 }
  0xdd   :  { %699 = vmatprep.mubr.f32.mxu0 %v3450_v11 }
  0xe0   :  { %1913 = vmatmul.mubr.msk.f32.gmra.mrb[40].mxu0 %vm382_vm0, %v138_v59 }
  0xe1   :  { %705 = vmatprep.mubr.f32.mxu0 %v3450_v11 }
  0xe4   :  { %1914 = vmatmul.mubr.msk.f32.gmra.mrb[42].mxu0 %vm382_vm0, %v139_v60 }
  0xe5   :  { %711 = vmatprep.mubr.f32.mxu0 %v3450_v11 }
  0xe8   :  { %1915 = vmatmul.mubr.msk.f32.gmra.mrb[44].mxu0 %vm382_vm0, %v140_v61 }
  0xe9   :  { %717 = vmatprep.mubr.f32.mxu0 %v3450_v11 }
  0xec   :  { %1916 = vmatmul.mubr.msk.f32.gmra.mrb[46].mxu0 %vm382_vm0, %v141_v62 }
  0xed   :  { %723 = vmatprep.mubr.f32.mxu0 %v3450_v11 }
  0xf0   :  { %1917 = vmatmul.mubr.msk.f32.gmra.mrb[48].mxu0 %vm382_vm0, %v142_v63 }
  0xf1   :  { %729 = vmatprep.mubr.f32.mxu0 %v3450_v11 }
  0xf4   :  { %1918 = vmatmul.mubr.msk.f32.gmra.mrb[50].mxu0 %vm382_vm0, %v143_v0 }
  0xf5   :  { %735 = vmatprep.mubr.f32.mxu0 %v3450_v11 }
  0xf8   :  { %1919 = vmatmul.mubr.msk.f32.gmra.mrb[52].mxu0 %vm382_vm0, %v144_v1 }
  0xf9   :  { %741 = vmatprep.mubr.f32.mxu0 %v3450_v11 }
  0xfc   :  { %1920 = vmatmul.mubr.msk.f32.gmra.mrb[54].mxu0 %vm382_vm0, %v145_v2 }
  0xfd   :  { %747 = vmatprep.mubr.f32.mxu0 %v3450_v11 }
 0x100   :  { %1921 = vmatmul.mubr.msk.f32.gmra.mrb[56].mxu0 %vm382_vm0, %v146_v3 }
 0x101   :  { %753 = vmatprep.mubr.f32.mxu0 %v3450_v11 }
 0x104   :  { %1922 = vmatmul.mubr.msk.f32.gmra.mrb[58].mxu0 %vm382_vm0, %v147_v4 }
 0x163   :  { %v581_v6 = vpop.f32.mrb[0].mxu0  ;;  %v2839_v7 = vpop.f32.mrb[0].mxu1 }
 0x164   :  { %3464 = vst [vmem:[#allocation5_spill] sm:$0xff] %v2839_v7  ;;  %v583_v8 = vpop.f32.mrb[1].mxu0  ;;  %v2841_v9 = vpop.f32.mrb[1].mxu1  ;;  %v582_v26 = vadd.f32 %v581_v6, %v165_v5 }
 0x165   :  { %3465 = vst [vmem:[#allocation6_spill] sm:$0xff] %v2841_v9  ;;  %v584_v28 = vadd.f32 %v583_v8, %v165_v5 }
 0x166   :  { %2009 = vtanh.f32 %v582_v26 }
 0x167   :  { %v587_v12 = vpop.f32.mrb[2].mxu0  ;;  %v2843_v13 = vpop.f32.mrb[2].mxu1 }
 0x168   :  { %3466 = vst [vmem:[#allocation7_spill] sm:$0xff] %v2843_v13  ;;  %v589_v14 = vpop.f32.mrb[3].mxu0  ;;  %v2845_v15 = vpop.f32.mrb[3].mxu1  ;;  %v588_v34 = vadd.f32 %v587_v12, %v170_v10 }
 0x169   :  { %3467 = vst [vmem:[#allocation8_spill] sm:$0xff] %v2845_v15  ;;  %v590_v37 = vadd.f32 %v589_v14, %v170_v10 }
 0x16b   :  { %v593_v17 = vpop.f32.mrb[4].mxu0  ;;  %v2847_v18 = vpop.f32.mrb[4].mxu1 }
 0x16c   :  { %3468 = vst [vmem:[#allocation9_spill] sm:$0xff] %v2847_v18  ;;  %v595_v19 = vpop.f32.mrb[5].mxu0  ;;  %v2849_v20 = vpop.f32.mrb[5].mxu1  ;;  %v594_v43 = vadd.f32 %v593_v17, %v175_v27 }
 0x16d   :  { %3469 = vst [vmem:[#allocation10_spill] sm:$0xff] %v2849_v20  ;;  %v596_v46 = vadd.f32 %v595_v19, %v175_v27 }
 0x16f   :  { %v599_v22 = vpop.f32.mrb[6].mxu0  ;;  %v2851_v23 = vpop.f32.mrb[6].mxu1 }
 0x170   :  { %3470 = vst [vmem:[#allocation11_spill] sm:$0xff] %v2851_v23  ;;  %v601_v24 = vpop.f32.mrb[7].mxu0  ;;  %v2853_v25 = vpop.f32.mrb[7].mxu1  ;;  %v600_v52 = vadd.f32 %v599_v22, %v180_v45 }
 0x171   :  { %3471 = vst [vmem:[#allocation12_spill] sm:$0xff] %v2853_v25  ;;  %v2010_v55 = vpop.eup %2009  ;;  %v602_v56 = vadd.f32 %v601_v24, %v180_v45 }
 0x173   :  { %v605_v29 = vpop.f32.mrb[8].mxu0  ;;  %v2855_v30 = vpop.f32.mrb[8].mxu1 }
 0x174   :  { %3472 = vst [vmem:[#allocation13_spill] sm:$0xff] %v2855_v30  ;;  %v606_v31 = vadd.f32 %v605_v29, %v185_v16  ;;  %v607_v32 = vpop.f32.mrb[9].mxu0  ;;  %v2857_v33 = vpop.f32.mrb[9].mxu1 }
 0x175   :  { %3473 = vst [vmem:[#allocation14_spill] sm:$0xff] %v2857_v33  ;;  %v608_v35 = vadd.f32 %v607_v32, %v185_v16 }
 0x176   :  { %2011 = vtanh.f32 %v606_v31 }
 0x177   :  { %2013 = vtanh.f32 %v584_v28  ;;  %v611_v38 = vpop.f32.mrb[10].mxu0  ;;  %v2859_v39 = vpop.f32.mrb[10].mxu1 }
 0x178   :  { %3474 = vst [vmem:[#allocation15_spill] sm:$0xff] %v2859_v39  ;;  %2015 = vtanh.f32 %v608_v35  ;;  %v612_v40 = vadd.f32 %v611_v38, %v190_v21  ;;  %v613_v41 = vpop.f32.mrb[11].mxu0  ;;  %v2861_v42 = vpop.f32.mrb[11].mxu1 }
 0x179   :  { %3475 = vst [vmem:[#allocation16_spill] sm:$0xff] %v2861_v42  ;;  %2017 = vtanh.f32 %v588_v34  ;;  %v614_v44 = vadd.f32 %v613_v41, %v190_v21 }
 0x17a   :  { %2019 = vtanh.f32 %v612_v40 }
 0x17b   :  { %2021 = vtanh.f32 %v590_v37  ;;  %v617_v47 = vpop.f32.mrb[12].mxu0  ;;  %v2863_v48 = vpop.f32.mrb[12].mxu1 }
 0x17c   :  { %3476 = vst [vmem:[#allocation17_spill] sm:$0xff] %v2863_v48  ;;  %2023 = vtanh.f32 %v614_v44  ;;  %v618_v49 = vadd.f32 %v617_v47, %v195_v36  ;;  %v619_v50 = vpop.f32.mrb[13].mxu0  ;;  %v2865_v51 = vpop.f32.mrb[13].mxu1 }
 0x17d   :  { %3477 = vst [vmem:[#allocation18_spill] sm:$0xff] %v2865_v51  ;;  %2025 = vtanh.f32 %v594_v43  ;;  %v620_v53 = vadd.f32 %v619_v50, %v195_v36 }
 0x17e   :  { %2027 = vtanh.f32 %v618_v49 }
 0x17f   :  { %2029 = vtanh.f32 %v596_v46  ;;  %v623_v57 = vpop.f32.mrb[14].mxu0  ;;  %v2867_v58 = vpop.f32.mrb[14].mxu1 }
 0x180   :  { %3478 = vst [vmem:[#allocation19_spill] sm:$0xff] %v2867_v58  ;;  %v2012_v59 = vpop.eup %2011  ;;  %2031 = vtanh.f32 %v620_v53  ;;  %v624_v60 = vadd.f32 %v623_v57, %v200_v54  ;;  %v625_v61 = vpop.f32.mrb[15].mxu0 }
 0x181   :  { %v2869_v62 = vpop.f32.mrb[15].mxu1  ;;  %v2014_v63 = vpop.eup %2013  ;;  %2033 = vtanh.f32 %v600_v52  ;;  %v2871_v0 = vmul.f32 %v2012_v59, %v2010_v55  ;;  %v626_v1 = vadd.f32 %v625_v61, %v200_v54 }
 0x182   :  { %3479 = vst [vmem:[#allocation20_spill] sm:$0xff] %v2869_v62  ;;  %v2016_v2 = vpop.eup %2015  ;;  %2035 = vtanh.f32 %v624_v60 }
 0x183   :  { %v2018_v3 = vpop.eup %2017  ;;  %2037 = vtanh.f32 %v602_v56  ;;  %v2873_v4 = vmul.f32 %v2016_v2, %v2014_v63  ;;  %v2875_v5 = vpop.f32.mrb[16].mxu0  ;;  %v3459_v21 = vand.u32 2147483647, %v2871_v0 }
 0x184   :  { %v2877_v6 = vpop.f32.mrb[16].mxu1  ;;  %v2020_v8 = vpop.eup %2019  ;;  %2039 = vtanh.f32 %v626_v1 }
 0x185   :  { %3480 = vst [vmem:[#allocation21_spill] sm:$0xff] %v2877_v6  ;;  %v631_v10 = vpop.f32.mrb[17].mxu0  ;;  %v2879_v12 = vpop.f32.mrb[17].mxu1  ;;  %v2881_v16 = vmul.f32 %v2020_v8, %v2018_v3  ;;  %v3455_v34 = vand.u32 2147483647, %v2873_v4 }
 0x186   :  { %3481 = vst [vmem:[#allocation22_spill] sm:$0xff] %v2879_v12  ;;  %v2022_v14 = vpop.eup %2021 }
 0x187   :  { %v2024_v17 = vpop.eup %2023  ;;  %v3458_v22 = vand.u32 2147483647, %v2881_v16  ;;  %v635_v26 = vpop.f32.mrb[18].mxu0 }
 0x188   :  { %v2026_v19 = vpop.eup %2025  ;;  %v2885_v24 = vmul.f32 %v2024_v17, %v2022_v14  ;;  %v2887_v27 = vpop.f32.mrb[18].mxu1 }
 0x189   :  { %3482 = vst [vmem:[#allocation23_spill] sm:$0xff] %v2887_v27  ;;  %v2028_v28 = vpop.eup %2027  ;;  %v637_v29 = vpop.f32.mrb[19].mxu0  ;;  %v948_v35 = vadd.f32 %v3458_v22, %v3459_v21 }
 0x18a   :  { %v2889_v31 = vpop.f32.mrb[19].mxu1  ;;  %v2030_v32 = vpop.eup %2029  ;;  %v3454_v36 = vand.u32 2147483647, %v2885_v24  ;;  %v2897_v37 = vmul.f32 %v2028_v28, %v2026_v19 }
 0x18b   :  { %3483 = vst [vmem:[#allocation24_spill] sm:$0xff] %v2889_v31  ;;  %v2032_v38 = vpop.eup %2031  ;;  %v641_v45 = vpop.f32.mrb[20].mxu0 }
 0x18c   :  { %v2034_v40 = vpop.eup %2033  ;;  %v957_v41 = vadd.f32 %v3454_v36, %v3455_v34  ;;  %v3457_v43 = vand.u32 2147483647, %v2897_v37  ;;  %v2904_v44 = vmul.f32 %v2032_v38, %v2030_v32  ;;  %v2906_v46 = vpop.f32.mrb[20].mxu1 }
 0x18d   :  { %3484 = vst [vmem:[#allocation25_spill] sm:$0xff] %v2906_v46  ;;  %v2036_v47 = vpop.eup %2035  ;;  %v643_v49 = vpop.f32.mrb[21].mxu0 }
 0x18e   :  { %v2908_v50 = vpop.f32.mrb[21].mxu1  ;;  %v2038_v52 = vpop.eup %2037  ;;  %v949_v53 = vadd.f32 %v948_v35, %v3457_v43  ;;  %v3453_v54 = vand.u32 2147483647, %v2904_v44  ;;  %v2913_v55 = vmul.f32 %v2036_v47, %v2034_v40 }
 0x18f   :  { %3485 = vst [vmem:[#allocation26_spill] sm:$0xff] %v2908_v50  ;;  %v2040_v56 = vpop.eup %2039  ;;  %v647_v61 = vpop.f32.mrb[22].mxu0 }
 0x190   :  { %v958_v57 = vadd.f32 %v957_v41, %v3453_v54  ;;  %v3456_v59 = vand.u32 2147483647, %v2913_v55  ;;  %v2918_v60 = vmul.f32 %v2040_v56, %v2038_v52  ;;  %v2920_v63 = vpop.f32.mrb[22].mxu1  ;;  %v649_v1 = vpop.f32.mrb[23].mxu0 }
 0x191   :  { %3486 = vst [vmem:[#allocation27_spill] sm:$0xff] %v2920_v63  ;;  %v2922_v2 = vpop.f32.mrb[23].mxu1  ;;  %v205_v41 = vpop.permute.xlu0 %204 }
 0x192   :  { %3487 = vst [vmem:[#allocation28_spill] sm:$0xff] %v2922_v2  ;;  %v950_v3 = vadd.f32 %v949_v53, %v3456_v59  ;;  %v3452_v8 = vand.u32 2147483647, %v2918_v60  ;;  %v630_v34 = vadd.f32 %v2875_v5, %v205_v41  ;;  %v632_v59 = vadd.f32 %v631_v10, %v205_v41 }
 0x193   :  { %v2929_v19 = vpop.f32.mrb[24].mxu0  ;;  %v2931_v28 = vpop.f32.mrb[24].mxu1 }
 0x194   :  { %v951_v14 = vrot.slane %v950_v3, 4  ;;  %v959_v17 = vadd.f32 %v958_v57, %v3452_v8  ;;  %3488 = vst [vmem:[#allocation29_spill] sm:$0xff] %v2931_v28  ;;  %v2933_v32 = vpop.f32.mrb[25].mxu0  ;;  %v2935_v35 = vpop.f32.mrb[25].mxu1  ;;  %2041 = vtanh.f32 %v630_v34 }
 0x195   :  { %3489 = vst [vmem:[#allocation30_spill] sm:$0xff] %v2935_v35  ;;  %v210_v8 = vpop.permute.xlu1 %209  ;;  %v215_v21 = vpop.permute.xlu0 %214  ;;  %2043 = vtanh.f32 %v632_v59 }
 0x196   :  { %v952_v38 = vadd.f32 %v951_v14, %v950_v3  ;;  %v960_v40 = vrot.slane %v959_v17, 4  ;;  %v636_v14 = vadd.f32 %v635_v26, %v210_v8 }
 0x197   :  { %v2937_v53 = vpop.f32.mrb[26].mxu0  ;;  %v2939_v56 = vpop.f32.mrb[26].mxu1 }
 0x198   :  { %v953_v47 = vrot.slane %v952_v38, 2  ;;  %v961_v52 = vadd.f32 %v960_v40, %v959_v17  ;;  %3490 = vst [vmem:[#allocation31_spill] sm:$0xff] %v2939_v56  ;;  %v2941_v11 = vpop.f32.mrb[27].mxu0  ;;  %v2943_v57 = vpop.f32.mrb[27].mxu1  ;;  %v638_v17 = vadd.f32 %v637_v29, %v210_v8  ;;  %2045 = vtanh.f32 %v636_v14 }
 0x199   :  { %3491 = vst [vmem:[#allocation32_spill] sm:$0xff] %v2943_v57  ;;  %v642_v57 = vadd.f32 %v641_v45, %v215_v21  ;;  %v220_v28 = vpop.permute.xlu1 %219 }
 0x19a   :  { %v954_v54 = vadd.f32 %v953_v47, %v952_v38  ;;  %v962_v36 = vrot.slane %v961_v52, 2  ;;  %2047 = vtanh.f32 %v638_v17  ;;  %v648_v10 = vadd.f32 %v647_v61, %v220_v28 }
 0x19b   :  { %v2946_v22 = vpop.f32.mrb[28].mxu0  ;;  %v650_v8 = vadd.f32 %v649_v1, %v220_v28  ;;  %v3492_v1 = vand.u32 2147483647, %v2871_v0  ;;  %v3495_v17 = vand.u32 2147483647, %v2913_v55 }
 0x19c   :  { %v955_v43 = vrot.slane %v954_v54, 1  ;;  %v963_v3 = vadd.f32 %v962_v36, %v961_v52  ;;  %v2948_v40 = vpop.f32.mrb[29].mxu0  ;;  %v644_v36 = vadd.f32 %v643_v49, %v215_v21  ;;  %v3497_v0 = vand.u32 2147483647, %v2885_v24 }
 0x19d   :  { %v3499_v55 = vand.u32 2147483647, %v2918_v60  ;;  %v230_v6 = vpop.permute.xlu1 %229 }
 0x19e   :  { %v956_v56 = vadd.f32 %v955_v43, %v954_v54  ;;  %v964_v35 = vrot.slane %v963_v3, 1  ;;  %v2042_v45 = vpop.eup %2041  ;;  %v662_v25 = vadd.f32 %v2941_v11, %v230_v6 }
 0x19f   :  { %v2950_v5 = vpop.f32.mrb[30].mxu0  ;;  %v2044_v59 = vpop.eup %2043 }
 0x1a0   :  { %v966_v38 = vmax.f32 %v956_v56, 1e-30  ;;  %v965_v47 = vadd.f32 %v964_v35, %v963_v3  ;;  %v2952_v26 = vpop.f32.mrb[31].mxu0  ;;  %v3493_v56 = vand.u32 2147483647, %v2881_v16 }
 0x1a1   :  { %v3494_v3 = vand.u32 2147483647, %v2897_v37  ;;  %v3498_v37 = vand.u32 2147483647, %v2904_v44  ;;  %v1006_v48 = vpop.permute.xlu1 %1005 }
 0x1a2   :  { %2049 = vrcp.f32 %v966_v38  ;;  %v967_v29 = vmax.f32 %v965_v47, 1e-30  ;;  %v2046_v35 = vpop.eup %2045 }
 0x1a3   :  { %2051 = vtanh.f32 %v642_v57  ;;  %v2954_v43 = vpop.f32.mrb[32].mxu0 }
 0x1a4   :  { %2053 = vrcp.f32 %v967_v29  ;;  %v2956_v34 = vpop.f32.mrb[33].mxu0  ;;  %v2048_v41 = vpop.eup %2047 }
 0x1a5   :  { %2055 = vtanh.f32 %v648_v10 }
 0x1a6   :  { %2057 = vtanh.f32 %v644_v36 }
 0x1a7   :  { %2059 = vtanh.f32 %v650_v8  ;;  %v2958_v54 = vpop.f32.mrb[34].mxu0  ;;  %v3496_v8 = vand.u32 2147483647, %v2873_v4 }
 0x1a8   :  { %v2960_v61 = vpop.f32.mrb[35].mxu0 }
 0x1ab   :  { %v2962_v21 = vpop.f32.mrb[36].mxu0 }
 0x1ac   :  { %v2050_v52 = vpop.eup %2049  ;;  %v2972_v47 = vpop.f32.mrb[37].mxu0 }
 0x1ad   :  { %v2052_v49 = vpop.eup %2051  ;;  %v970_v28 = vmul.f32 %v2050_v52, %v3492_v1  ;;  %v972_v57 = vmul.f32 %v2050_v52, %v3493_v56  ;;  %v974_v14 = vmul.f32 %v2050_v52, %v3494_v3  ;;  %v976_v38 = vmul.f32 %v2050_v52, %v3495_v17 }
 0x1ae   :  { %v2054_v10 = vpop.eup %2053 }
 0x1af   :  { %v2056_v29 = vpop.eup %2055  ;;  %v978_v36 = vmul.f32 %v2042_v45, %v970_v28  ;;  %v971_v2 = vmul.f32 %v2054_v10, %v3496_v8  ;;  %v980_v63 = vmul.f32 %v2046_v35, %v972_v57  ;;  %v973_v1 = vmul.f32 %v2054_v10, %v3497_v0  ;;  %v2982_v17 = vpop.f32.mrb[38].mxu0 }
 0x1b0   :  { %v2058_v16 = vpop.eup %2057  ;;  %v982_v56 = vmul.f32 %v2052_v49, %v974_v14  ;;  %v975_v3 = vmul.f32 %v2054_v10, %v3498_v37  ;;  %v984_v50 = vmul.f32 %v2056_v29, %v976_v38  ;;  %v977_v52 = vmul.f32 %v2054_v10, %v3499_v55  ;;  %v2984_v28 = vpop.f32.mrb[39].mxu0  ;;  %v994_v55 = vld [vmem:[%s3447_s2] sm:$0xff] }
 0x1b1   :  { %v2060_v46 = vpop.eup %2059  ;;  %2061 = vtanh.f32 %v978_v36  ;;  %v979_v45 = vmul.f32 %v2044_v59, %v971_v2  ;;  %v981_v4 = vmul.f32 %v2048_v41, %v973_v1 }
 0x1b2   :  { %2063 = vtanh.f32 %v980_v63  ;;  %v983_v24 = vmul.f32 %v2058_v16, %v975_v3  ;;  %v985_v35 = vmul.f32 %v2060_v46, %v977_v52 }
 0x1b3   :  { %2065 = vtanh.f32 %v979_v45  ;;  %v2986_v49 = vpop.f32.mrb[40].mxu0 }
 0x1b4   :  { %2067 = vtanh.f32 %v981_v4  ;;  %v2988_v44 = vpop.f32.mrb[41].mxu0  ;;  %v3500_v4 = vmov 0.0  }
 0x1b5   :  { %2069 = vtanh.f32 %v982_v56 }
 0x1b6   :  { %2071 = vtanh.f32 %v983_v24  ;;  %v995_v24 = vld [vmem:[%s3447_s2 + $0x8] sm:$0xff] }
 0x1b7   :  { %2073 = vtanh.f32 %v984_v50  ;;  %v2990_v60 = vpop.f32.mrb[42].mxu0 }
 0x1b8   :  { %2075 = vtanh.f32 %v985_v35  ;;  %v2992_v57 = vpop.f32.mrb[43].mxu0 }
 0x1bb   :  { %v2994_v2 = vpop.eup %2061  ;;  %v2998_v63 = vpop.f32.mrb[44].mxu0 }
 0x1bc   :  { %v2996_v59 = vpop.eup %2063  ;;  %v3002_v41 = vpop.f32.mrb[45].mxu0 }
 0x1bd   :  { %v3000_v46 = vpop.eup %2065  ;;  %v1971_v36 = vpack.c.bf16 %v2996_v59, %v2994_v2 }
 0x1be   :  { %v3004_v14 = vpop.eup %2067 }
 0x1bf   :  { %v3006_v38 = vpop.eup %2069  ;;  %v1969_v50 = vpack.c.bf16 %v3004_v14, %v3000_v46  ;;  %v3012_v29 = vpop.f32.mrb[46].mxu0 }
 0x1c0   :  { %v3010_v10 = vpop.eup %2071  ;;  %v3018_v0 = vpop.f32.mrb[47].mxu0 }
 0x1c1   :  { %v3016_v8 = vpop.eup %2073  ;;  %1970 = vmatprep.subr.bf16.mxu1 %v1969_v50 }
 0x1c2   :  { %v3020_v1 = vpop.eup %2075  ;;  %1972 = vmatpush1.bf16.msra.mxu1 %v1971_v36  ;;  %v1975_v37 = vpack.c.bf16 %v3016_v8, %v3006_v38  ;;  %v996_v36 = vld [vmem:[%s3447_s2 + $0x10] sm:$0xff] }
 0x1c3   :  { %v1973_v16 = vpack.c.bf16 %v3020_v1, %v3010_v10  ;;  %v3024_v56 = vpop.f32.mrb[48].mxu0 }
 0x1c4   :  { %v3028_v3 = vpop.f32.mrb[49].mxu0 }
 0x1c5   :  { %1974 = vmatprep.subr.bf16.mxu1 %v1973_v16 }
 0x1c6   :  { %1976 = vmatpush1.bf16.msra.mxu1 %v1975_v37 }
 0x1c7   :  { %v3033_v52 = vpop.f32.mrb[50].mxu0 }
 0x1c8   :  { %v3036_v45 = vpop.f32.mrb[51].mxu0 }
 0x1c9   :  { %1937 = vmatmul.mubr.msk.f32.vlgmr.msra.gmra.mrb[28].mxu1 %vm1018_vm1, %v994_v55  ;;  %v997_v55 = vld [vmem:[%s3447_s2 + $0x18] sm:$0xff] }
 0x1ca   :  { %1101 = vmatprep.mubr.f32.mxu1 %v3500_v4 }
 0x1cb   :  { %v3042_v35 = vpop.f32.mrb[52].mxu0 }
 0x1cc   :  { %v3045_v50 = vpop.f32.mrb[53].mxu0 }
 0x1cd   :  { %1938 = vmatmul.mubr.msk.f32.gmra.mrb[30].mxu1 %vm1018_vm1, %v995_v24 }
 0x1ce   :  { %1107 = vmatprep.mubr.f32.mxu1 %v3500_v4 }
 0x1cf   :  { %v3051_v16 = vpop.f32.mrb[54].mxu0 }
 0x1d0   :  { %v3054_v37 = vpop.f32.mrb[55].mxu0 }
 0x1d1   :  { %1939 = vmatmul.mubr.msk.f32.gmra.mrb[32].mxu1 %vm1018_vm1, %v996_v36  ;;  %v225_v36 = vpop.permute.xlu0 %224 }
 0x1d2   :  { %1113 = vmatprep.mubr.f32.mxu1 %v3500_v4  ;;  %v654_v58 = vadd.f32 %v2929_v19, %v225_v36  ;;  %v656_v51 = vadd.f32 %v2933_v32, %v225_v36  ;;  %v1011_v36 = vpop.permute.xlu1 %1010 }
 0x1d3   :  { %v3060_v24 = vpop.f32.mrb[56].mxu0 }
 0x1d4   :  { %v3063_v31 = vpop.f32.mrb[57].mxu0  ;;  %2077 = vtanh.f32 %v654_v58 }
 0x1d5   :  { %1940 = vmatmul.mubr.msk.f32.gmra.mrb[34].mxu1 %vm1018_vm1, %v997_v55  ;;  %3501 = vst [vmem:[#allocation33_spill] sm:$0xff] %v3063_v31  ;;  %v1001_v62 = vpop.permute.xlu0 %1000  ;;  %v660_v55 = vadd.f32 %v2937_v53, %v230_v6  ;;  %2079 = vtanh.f32 %v656_v51 }
 0x1d6   :  { %1299 = vmatprep.mubr.f32.mxu1 %v3500_v4 }
 0x1d7   :  { %v3066_v27 = vpop.f32.mrb[58].mxu0 }
 0x1d8   :  { %3502 = vst [vmem:[#allocation34_spill] sm:$0xff] %v3066_v27  ;;  %v3068_v12 = vpop.f32.mrb[59].mxu0 }
 0x1d9   :  { %3503 = vst [vmem:[#allocation35_spill] sm:$0xff] %v3068_v12  ;;  %v235_v30 = vpop.permute.xlu0 %234 }
 0x1da   :  { %v666_v19 = vadd.f32 %v2946_v22, %v235_v30  ;;  %v668_v58 = vadd.f32 %v2948_v40, %v235_v30 }
 0x29c   :  { %v1097_v42 = vpop.f32.mrb[28].mxu1 }
 0x29d   :  { %v1098_v39 = vadd.f32 %v1097_v42, %v1001_v62  ;;  %v1099_v33 = vpop.f32.mrb[29].mxu1  ;;  %v240_v42 = vpop.permute.xlu0 %239 }
 0x29e   :  { %v1100_v23 = vadd.f32 %v1099_v33, %v1001_v62  ;;  %v672_v11 = vadd.f32 %v2950_v5, %v240_v42 }
 0x29f   :  { %2081 = vtanh.f32 %v1098_v39  ;;  %v674_v39 = vadd.f32 %v2952_v26, %v240_v42 }
 0x2a0   :  { %2083 = vtanh.f32 %v1100_v23  ;;  %v1103_v20 = vpop.f32.mrb[30].mxu1 }
 0x2a1   :  { %2085 = vtanh.f32 %v660_v55  ;;  %v1104_v18 = vadd.f32 %v1103_v20, %v1006_v48  ;;  %v1105_v32 = vpop.f32.mrb[31].mxu1  ;;  %v2078_v20 = vpop.eup %2077 }
 0x2a2   :  { %2087 = vtanh.f32 %v662_v25  ;;  %v1106_v53 = vadd.f32 %v1105_v32, %v1006_v48  ;;  %v2080_v6 = vpop.eup %2079  ;;  %v1016_v25 = vpop.permute.xlu1 %1015 }
 0x2a3   :  { %2089 = vtanh.f32 %v1104_v18  ;;  %v245_v12 = vpop.permute.xlu0 %244 }
 0x2a4   :  { %2091 = vtanh.f32 %v1106_v53  ;;  %v1109_v51 = vpop.f32.mrb[32].mxu1 }
 0x2a5   :  { %2093 = vtanh.f32 %v666_v19  ;;  %v1110_v33 = vadd.f32 %v1109_v51, %v1011_v36  ;;  %v1111_v23 = vpop.f32.mrb[33].mxu1 }
 0x2a6   :  { %2095 = vtanh.f32 %v668_v58  ;;  %v1112_v62 = vadd.f32 %v1111_v23, %v1011_v36  ;;  %v250_v27 = vpop.permute.xlu1 %249 }
 0x2a7   :  { %2097 = vtanh.f32 %v1110_v33 }
 0x2a8   :  { %2099 = vtanh.f32 %v1112_v62  ;;  %v1115_v30 = vpop.f32.mrb[34].mxu1 }
 0x2a9   :  { %v2082_v48 = vpop.eup %2081  ;;  %2101 = vtanh.f32 %v672_v11  ;;  %v1116_v18 = vadd.f32 %v1115_v30, %v1016_v25  ;;  %v1117_v22 = vpop.f32.mrb[35].mxu1 }
 0x2aa   :  { %v2084_v40 = vpop.eup %2083  ;;  %2103 = vtanh.f32 %v674_v39  ;;  %v3078_v55 = vmul.f32 %v2082_v48, %v2078_v20  ;;  %v1118_v5 = vadd.f32 %v1117_v22, %v1016_v25 }
 0x2ab   :  { %v2086_v19 = vpop.eup %2085  ;;  %v3080_v32 = vmul.f32 %v2084_v40, %v2080_v6  ;;  %2105 = vtanh.f32 %v1116_v18 }
 0x2ac   :  { %v2088_v26 = vpop.eup %2087  ;;  %2107 = vtanh.f32 %v1118_v5  ;;  %v3461_v33 = vand.u32 2147483647, %v3078_v55 }
 0x2ad   :  { %v2090_v36 = vpop.eup %2089  ;;  %v3463_v62 = vand.u32 2147483647, %v3080_v32 }
 0x2ae   :  { %v2092_v58 = vpop.eup %2091  ;;  %v3082_v53 = vmul.f32 %v2090_v36, %v2086_v19 }
 0x2af   :  { %v2094_v42 = vpop.eup %2093  ;;  %v3084_v51 = vmul.f32 %v2092_v58, %v2088_v26 }
 0x2b0   :  { %v2096_v11 = vpop.eup %2095  ;;  %v3460_v23 = vand.u32 2147483647, %v3082_v53 }
 0x2b1   :  { %v2098_v39 = vpop.eup %2097  ;;  %v3462_v20 = vand.u32 2147483647, %v3084_v51 }
 0x2b2   :  { %v2100_v6 = vpop.eup %2099  ;;  %v1144_v25 = vadd.f32 %v3460_v23, %v3461_v33  ;;  %v3094_v30 = vmul.f32 %v2098_v39, %v2094_v42 }
 0x2b3   :  { %v2102_v48 = vpop.eup %2101  ;;  %v1153_v18 = vadd.f32 %v3462_v20, %v3463_v62  ;;  %v3100_v22 = vmul.f32 %v2100_v6, %v2096_v11  ;;  %v678_v62 = vadd.f32 %v2954_v43, %v245_v12  ;;  %v260_v43 = vpop.permute.xlu1 %259 }
 0x2b4   :  { %v2104_v40 = vpop.eup %2103  ;;  %v1140_v5 = vand.u32 2147483647, %v3094_v30 }
 0x2b5   :  { %v2106_v19 = vpop.eup %2105  ;;  %v1141_v26 = vand.u32 2147483647, %v3100_v22  ;;  %v680_v22 = vadd.f32 %v2956_v34, %v245_v12  ;;  %2109 = vtanh.f32 %v678_v62  ;;  %v696_v34 = vadd.f32 %v2982_v17, %v260_v43 }
 0x2b6   :  { %v2108_v36 = vpop.eup %2107  ;;  %v1145_v58 = vadd.f32 %v1144_v25, %v1140_v5  ;;  %v1134_v15 = vmul.f32 %v2106_v19, %v2102_v48  ;;  %v684_v25 = vadd.f32 %v2958_v54, %v250_v27  ;;  %v3504_v17 = vand.u32 2147483647, %v3078_v55 }
 0x2b7   :  { %v1154_v23 = vadd.f32 %v1153_v18, %v1141_v26  ;;  %v1135_v42 = vmul.f32 %v2108_v36, %v2104_v40  ;;  %v255_v18 = vpop.permute.xlu0 %254  ;;  %2111 = vtanh.f32 %v680_v22 }
 0x2b8   :  { %v1142_v39 = vand.u32 2147483647, %v1134_v15  ;;  %v686_v15 = vadd.f32 %v2960_v61, %v250_v27  ;;  %2113 = vtanh.f32 %v684_v25  ;;  %v698_v27 = vadd.f32 %v2984_v28, %v260_v43 }
 0x2b9   :  { %v1143_v33 = vand.u32 2147483647, %v1135_v42 }
 0x2ba   :  { %v1146_v13 = vadd.f32 %v1145_v58, %v1142_v39  ;;  %2115 = vtanh.f32 %v686_v15 }
 0x2bb   :  { %v1155_v9 = vadd.f32 %v1154_v23, %v1143_v33  ;;  %v690_v23 = vadd.f32 %v2962_v21, %v255_v18 }
 0x2bc   :  { %v1147_v7 = vrot.slane %v1146_v13, 4 }
 0x2bd   :  { %v1156_v20 = vrot.slane %v1155_v9, 4  ;;  %2117 = vtanh.f32 %v690_v23 }
 0x2be   :  { %v1148_v11 = vadd.f32 %v1147_v7, %v1146_v13  ;;  %v692_v7 = vadd.f32 %v2972_v47, %v255_v18  ;;  %v3506_v18 = vand.u32 2147483647, %v3080_v32 }
 0x2bf   :  { %v1157_v6 = vadd.f32 %v1156_v20, %v1155_v9  ;;  %v2110_v61 = vpop.eup %2109 }
 0x2c0   :  { %v1149_v30 = vrot.slane %v1148_v11, 2  ;;  %2119 = vtanh.f32 %v692_v7 }
 0x2c1   :  { %v1158_v31 = vrot.slane %v1157_v6, 2  ;;  %v2112_v21 = vpop.eup %2111 }
 0x2c2   :  { %v1150_v48 = vadd.f32 %v1149_v30, %v1148_v11  ;;  %v2114_v47 = vpop.eup %2113  ;;  %v3505_v30 = vand.u32 2147483647, %v3082_v53 }
 0x2c3   :  { %v1159_v40 = vadd.f32 %v1158_v31, %v1157_v6 }
 0x2c4   :  { %v1151_v19 = vrot.slane %v1150_v48, 1  ;;  %v2116_v62 = vpop.eup %2115 }
 0x2c5   :  { %v1160_v9 = vrot.slane %v1159_v40, 1 }
 0x2c6   :  { %v1152_v13 = vadd.f32 %v1151_v19, %v1150_v48 }
 0x2c7   :  { %v1161_v12 = vadd.f32 %v1160_v9, %v1159_v40  ;;  %v2118_v20 = vpop.eup %2117  ;;  %v3507_v40 = vand.u32 2147483647, %v3084_v51 }
 0x2c8   :  { %v1162_v54 = vmax.f32 %v1152_v13, 1e-30 }
 0x2c9   :  { %v1163_v31 = vmax.f32 %v1161_v12, 1e-30 }
 0x2ca   :  { %2121 = vrcp.f32 %v1162_v54  ;;  %v2120_v36 = vpop.eup %2119 }
 0x2cb   :  { %2123 = vrcp.f32 %v1163_v31 }
 0x2cc   :  { %2125 = vtanh.f32 %v696_v34 }
 0x2cd   :  { %2127 = vtanh.f32 %v698_v27 }
 0x2d4   :  { %v2122_v58 = vpop.eup %2121 }
 0x2d5   :  { %v2124_v42 = vpop.eup %2123  ;;  %v1172_v11 = vmul.f32 %v2122_v58, %v1142_v39  ;;  %v1166_v6 = vmul.f32 %v2122_v58, %v3504_v17  ;;  %v1168_v28 = vmul.f32 %v2122_v58, %v3505_v30  ;;  %v1170_v22 = vmul.f32 %v2122_v58, %v1140_v5  ;;  %v270_v17 = vpop.permute.xlu1 %269 }
 0x2d6   :  { %v2126_v25 = vpop.eup %2125  ;;  %v1173_v48 = vmul.f32 %v2124_v42, %v1143_v33  ;;  %v1167_v15 = vmul.f32 %v2124_v42, %v3506_v18  ;;  %v1169_v23 = vmul.f32 %v2124_v42, %v3507_v40  ;;  %v1171_v19 = vmul.f32 %v2124_v42, %v1141_v26  ;;  %v1944_v42 = vld [vmem:[%s3447_s2 + $0x38] sm:$0xff] }
 0x2d7   :  { %v2128_v7 = vpop.eup %2127  ;;  %v1180_v9 = vmul.f32 %v2126_v25, %v1172_v11  ;;  %v1174_v13 = vmul.f32 %v2110_v61, %v1166_v6  ;;  %v1176_v39 = vmul.f32 %v2114_v47, %v1168_v28  ;;  %v1178_v43 = vmul.f32 %v2118_v20, %v1170_v22  ;;  %v265_v11 = vpop.permute.xlu0 %264 }
 0x2d8   :  { %v1181_v55 = vmul.f32 %v2128_v7, %v1173_v48  ;;  %v1175_v12 = vmul.f32 %v2112_v21, %v1167_v15  ;;  %v1177_v34 = vmul.f32 %v2116_v62, %v1169_v23  ;;  %v1179_v53 = vmul.f32 %v2120_v36, %v1171_v19 }
 0x2d9   :  { %2129 = vtanh.f32 %v1180_v9  ;;  %v702_v30 = vadd.f32 %v2986_v49, %v265_v11  ;;  %v704_v28 = vadd.f32 %v2988_v44, %v265_v11  ;;  %v1211_v22 = vpop.permute.xlu1 %1210  ;;  %v708_v48 = vadd.f32 %v2990_v60, %v270_v17 }
 0x2da   :  { %2131 = vtanh.f32 %v1175_v12  ;;  %v710_v23 = vadd.f32 %v2992_v57, %v270_v17 }
 0x2db   :  { %2133 = vtanh.f32 %v1177_v34  ;;  %v1206_v6 = vpop.permute.xlu0 %1205 }
 0x2dc   :  { %2135 = vtanh.f32 %v1174_v13 }
 0x2dd   :  { %2137 = vtanh.f32 %v1176_v39  ;;  %v1216_v13 = vpop.permute.xlu1 %1215 }
 0x2de   :  { %2139 = vtanh.f32 %v1179_v53 }
 0x2df   :  { %2141 = vtanh.f32 %v1181_v55  ;;  %v275_v40 = vpop.permute.xlu0 %274 }
 0x2e0   :  { %2143 = vtanh.f32 %v1178_v43  ;;  %v714_v49 = vadd.f32 %v2998_v63, %v275_v40  ;;  %v716_v39 = vadd.f32 %v3002_v41, %v275_v40 }
 0x2e1   :  { %2145 = vtanh.f32 %v702_v30 }
 0x2e2   :  { %2147 = vtanh.f32 %v704_v28 }
 0x2e3   :  { %v2130_v32 = vpop.eup %2129  ;;  %v280_v43 = vpop.permute.xlu0 %279 }
 0x2e4   :  { %v2132_v51 = vpop.eup %2131  ;;  %v720_v57 = vadd.f32 %v3012_v29, %v280_v43  ;;  %v722_v53 = vadd.f32 %v3018_v0, %v280_v43 }
 0x2e5   :  { %v2134_v33 = vpop.eup %2133  ;;  %v3121_v5 = vadd.f32 %v2132_v51, %v3000_v46 }
 0x2e6   :  { %v2136_v26 = vpop.eup %2135  ;;  %v3124_v54 = vadd.f32 %v2134_v33, %v3004_v14  ;;  %v1221_v33 = vpop.permute.xlu1 %1220 }
 0x2e7   :  { %v2138_v27 = vpop.eup %2137  ;;  %v3127_v31 = vadd.f32 %v2136_v26, %v2994_v2  ;;  %v3143_v2 = vadd.f32 %v2130_v32, %v3016_v8  ;;  %v1943_v8 = vld [vmem:[%s3447_s2 + $0x30] sm:$0xff] }
 0x2e8   :  { %v2140_v61 = vpop.eup %2139  ;;  %v1977_v21 = vpack.c.bf16 %v3124_v54, %v3121_v5  ;;  %v3132_v47 = vadd.f32 %v2138_v27, %v2996_v59 }
 0x2e9   :  { %v2142_v62 = vpop.eup %2141  ;;  %v3135_v20 = vadd.f32 %v2140_v61, %v3010_v10 }
 0x2ea   :  { %v2144_v46 = vpop.eup %2143  ;;  %1978 = vmatprep.subr.bf16.mxu1 %v1977_v21  ;;  %v1979_v14 = vpack.c.bf16 %v3132_v47, %v3127_v31  ;;  %v3140_v36 = vadd.f32 %v2142_v62, %v3020_v1  ;;  %v1941_v1 = vld [vmem:[%s3447_s2 + $0x20] sm:$0xff] }
 0x2eb   :  { %v3146_v58 = vadd.f32 %v2144_v46, %v3006_v38  ;;  %v1942_v38 = vld [vmem:[%s3447_s2 + $0x28] sm:$0xff]  ;;  %v2146_v32 = vpop.eup %2145 }
 0x2ec   :  { %1980 = vmatpush1.bf16.msra.mxu1 %v1979_v14  ;;  %v1981_v59 = vpack.c.bf16 %v3140_v36, %v3135_v20  ;;  %v2148_v51 = vpop.eup %2147 }
 0x2ed   :  { %v1983_v10 = vpack.c.bf16 %v3143_v2, %v3146_v58 }
 0x2ee   :  { %1982 = vmatprep.subr.bf16.mxu1 %v1981_v59 }
 0x2f0   :  { %1984 = vmatpush1.bf16.msra.mxu1 %v1983_v10 }
 0x2f3   :  { %1945 = vmatmul.mubr.msk.f32.vlgmr.msra.gmra.mrb[36].mxu1 %vm1018_vm1, %v1941_v1 }
 0x2f4   :  { %1305 = vmatprep.mubr.f32.mxu1 %v3500_v4 }
 0x2f7   :  { %1946 = vmatmul.mubr.msk.f32.gmra.mrb[38].mxu1 %vm1018_vm1, %v1942_v38 }
 0x2f8   :  { %1311 = vmatprep.mubr.f32.mxu1 %v3500_v4 }
 0x2fb   :  { %1947 = vmatmul.mubr.msk.f32.gmra.mrb[40].mxu1 %vm1018_vm1, %v1943_v8 }
 0x2fc   :  { %1317 = vmatprep.mubr.f32.mxu1 %v3500_v4 }
 0x2ff   :  { %1948 = vmatmul.mubr.msk.f32.gmra.mrb[42].mxu1 %vm1018_vm1, %v1944_v42 }
 0x300   :  { %1503 = vmatprep.mubr.f32.mxu1 %v3500_v4 }
 0x3c6   :  { %v1301_v25 = vpop.f32.mrb[36].mxu1 }
 0x3c7   :  { %v1302_v18 = vadd.f32 %v1301_v25, %v1206_v6  ;;  %v1303_v15 = vpop.f32.mrb[37].mxu1 }
 0x3c8   :  { %v1304_v19 = vadd.f32 %v1303_v15, %v1206_v6 }
 0x3c9   :  { %2149 = vtanh.f32 %v1302_v18 }
 0x3ca   :  { %2151 = vtanh.f32 %v1304_v19  ;;  %v1307_v7 = vpop.f32.mrb[38].mxu1 }
 0x3cb   :  { %2153 = vtanh.f32 %v708_v48  ;;  %v1308_v9 = vadd.f32 %v1307_v7, %v1211_v22  ;;  %v1309_v44 = vpop.f32.mrb[39].mxu1 }
 0x3cc   :  { %2155 = vtanh.f32 %v710_v23  ;;  %v1310_v60 = vadd.f32 %v1309_v44, %v1211_v22 }
 0x3cd   :  { %2157 = vtanh.f32 %v1308_v9 }
 0x3ce   :  { %2159 = vtanh.f32 %v1310_v60  ;;  %v1313_v55 = vpop.f32.mrb[40].mxu1 }
 0x3cf   :  { %2161 = vtanh.f32 %v714_v49  ;;  %v1314_v12 = vadd.f32 %v1313_v55, %v1216_v13  ;;  %v1315_v34 = vpop.f32.mrb[41].mxu1 }
 0x3d0   :  { %2163 = vtanh.f32 %v716_v39  ;;  %v1316_v63 = vadd.f32 %v1315_v34, %v1216_v13 }
 0x3d1   :  { %2165 = vtanh.f32 %v1314_v12 }
 0x3d2   :  { %2167 = vtanh.f32 %v1316_v63  ;;  %v1319_v41 = vpop.f32.mrb[42].mxu1 }
 0x3d3   :  { %v2150_v26 = vpop.eup %2149  ;;  %2169 = vtanh.f32 %v720_v57  ;;  %v1320_v27 = vadd.f32 %v1319_v41, %v1221_v33  ;;  %v1321_v61 = vpop.f32.mrb[43].mxu1 }
 0x3d4   :  { %v2152_v21 = vpop.eup %2151  ;;  %2171 = vtanh.f32 %v722_v53  ;;  %v3180_v62 = vmul.f32 %v2150_v26, %v2146_v32  ;;  %v1322_v29 = vadd.f32 %v1321_v61, %v1221_v33  ;;  %v285_v53 = vpop.permute.xlu0 %284 }
 0x3d5   :  { %v2154_v46 = vpop.eup %2153  ;;  %v3182_v14 = vmul.f32 %v2152_v21, %v2148_v51  ;;  %2173 = vtanh.f32 %v1320_v27  ;;  %v726_v33 = vadd.f32 %v3024_v56, %v285_v53  ;;  %v290_v26 = vpop.permute.xlu1 %289  ;;  %v728_v27 = vadd.f32 %v3028_v3, %v285_v53 }
 0x3d6   :  { %v2156_v0 = vpop.eup %2155  ;;  %2175 = vtanh.f32 %v1322_v29  ;;  %v1340_v11 = vand.u32 2147483647, %v3180_v62  ;;  %v732_v21 = vadd.f32 %v3033_v52, %v290_v26 }
 0x3d7   :  { %v2158_v59 = vpop.eup %2157  ;;  %v1341_v30 = vand.u32 2147483647, %v3182_v14  ;;  %2177 = vtanh.f32 %v726_v33 }
 0x3d8   :  { %v2160_v10 = vpop.eup %2159  ;;  %v3184_v1 = vmul.f32 %v2158_v59, %v2154_v46  ;;  %v295_v46 = vpop.permute.xlu0 %294  ;;  %2179 = vtanh.f32 %v728_v27 }
 0x3d9   :  { %v2162_v38 = vpop.eup %2161  ;;  %v3186_v8 = vmul.f32 %v2160_v10, %v2156_v0  ;;  %v734_v0 = vadd.f32 %v3036_v45, %v290_v26  ;;  %v738_v10 = vadd.f32 %v3042_v35, %v295_v46  ;;  %2181 = vtanh.f32 %v732_v21 }
 0x3da   :  { %v2164_v42 = vpop.eup %2163  ;;  %v1342_v17 = vand.u32 2147483647, %v3184_v1 }
 0x3db   :  { %v2166_v6 = vpop.eup %2165  ;;  %v1343_v28 = vand.u32 2147483647, %v3186_v8  ;;  %2183 = vtanh.f32 %v734_v0  ;;  %v1952_v0 = vld [vmem:[%s3447_s2 + $0x58] sm:$0xff] }
 0x3dc   :  { %v2168_v22 = vpop.eup %2167  ;;  %v1348_v25 = vadd.f32 %v1342_v17, %v1340_v11  ;;  %v3196_v48 = vmul.f32 %v2166_v6, %v2162_v38  ;;  %2185 = vtanh.f32 %v738_v10 }
 0x3dd   :  { %v2170_v18 = vpop.eup %2169  ;;  %v1357_v15 = vadd.f32 %v1343_v28, %v1341_v30  ;;  %v3202_v40 = vmul.f32 %v2168_v22, %v2164_v42  ;;  %v740_v42 = vadd.f32 %v3045_v50, %v295_v46  ;;  %v300_v22 = vpop.permute.xlu1 %299 }
 0x3de   :  { %v2172_v23 = vpop.eup %2171  ;;  %v1344_v19 = vand.u32 2147483647, %v3196_v48  ;;  %v744_v52 = vadd.f32 %v3051_v16, %v300_v22  ;;  %v746_v45 = vadd.f32 %v3054_v37, %v300_v22 }
 0x3df   :  { %v2174_v7 = vpop.eup %2173  ;;  %v1345_v49 = vand.u32 2147483647, %v3202_v40  ;;  %2187 = vtanh.f32 %v740_v42 }
 0x3e0   :  { %v2176_v9 = vpop.eup %2175  ;;  %v1349_v44 = vadd.f32 %v1348_v25, %v1344_v19  ;;  %v1338_v13 = vmul.f32 %v2174_v7, %v2170_v18 }
 0x3e1   :  { %v1358_v39 = vadd.f32 %v1357_v15, %v1345_v49  ;;  %v1339_v60 = vmul.f32 %v2176_v9, %v2172_v23  ;;  %v2178_v35 = vpop.eup %2177  ;;  %v310_v10 = vpop.permute.xlu1 %309 }
 0x3e2   :  { %v1346_v43 = vand.u32 2147483647, %v1338_v13  ;;  %v2180_v50 = vpop.eup %2179 }
 0x3e3   :  { %v1347_v55 = vand.u32 2147483647, %v1339_v60  ;;  %v2182_v18 = vpop.eup %2181 }
 0x3e4   :  { %v1350_v57 = vadd.f32 %v1349_v44, %v1346_v43 }
 0x3e5   :  { %v1359_v12 = vadd.f32 %v1358_v39, %v1347_v55  ;;  %v2184_v15 = vpop.eup %2183  ;;  %v1415_v22 = vpop.permute.xlu1 %1414 }
 0x3e6   :  { %v1351_v34 = vrot.slane %v1350_v57, 4  ;;  %v2186_v40 = vpop.eup %2185 }
 0x3e7   :  { %v1360_v63 = vrot.slane %v1359_v12, 4 }
 0x3e8   :  { %v1352_v32 = vadd.f32 %v1351_v34, %v1350_v57 }
 0x3e9   :  { %v1361_v51 = vadd.f32 %v1360_v63, %v1359_v12  ;;  %v2188_v23 = vpop.eup %2187 }
 0x3ea   :  { %v1353_v41 = vrot.slane %v1352_v32, 2 }
 0x3eb   :  { %v1362_v61 = vrot.slane %v1361_v51, 2 }
 0x3ec   :  { %v1354_v29 = vadd.f32 %v1353_v41, %v1352_v32 }
 0x3ed   :  { %v1363_v59 = vadd.f32 %v1362_v61, %v1361_v51 }
 0x3ee   :  { %v1355_v38 = vrot.slane %v1354_v29, 1 }
 0x3ef   :  { %v1364_v56 = vrot.slane %v1363_v59, 1 }
 0x3f0   :  { %v1356_v6 = vadd.f32 %v1355_v38, %v1354_v29 }
 0x3f1   :  { %v1365_v3 = vadd.f32 %v1364_v56, %v1363_v59  ;;  %v305_v59 = vpop.permute.xlu0 %304  ;;  %v3508_v56 = vld [vmem:[#allocation33_spill] sm:$0xff] }
 0x3f2   :  { %v1366_v25 = vmax.f32 %v1356_v6, 1e-30  ;;  %v750_v42 = vadd.f32 %v3060_v24, %v305_v59  ;;  %v752_v6 = vadd.f32 %v3508_v56, %v305_v59 }
 0x3f3   :  { %v1367_v48 = vmax.f32 %v1365_v3, 1e-30 }
 0x3f4   :  { %2189 = vrcp.f32 %v1366_v25 }
 0x3f5   :  { %2191 = vrcp.f32 %v1367_v48  ;;  %v1410_v38 = vpop.permute.xlu0 %1409 }
 0x3f6   :  { %2193 = vtanh.f32 %v744_v52  ;;  %v3509_v52 = vld [vmem:[#allocation34_spill] sm:$0xff] }
 0x3f7   :  { %2195 = vtanh.f32 %v746_v45  ;;  %v756_v25 = vadd.f32 %v3509_v52, %v310_v10 }
 0x3fe   :  { %v2190_v7 = vpop.eup %2189 }
 0x3ff   :  { %v2192_v9 = vpop.eup %2191  ;;  %v1376_v44 = vmul.f32 %v2190_v7, %v1346_v43  ;;  %v1370_v16 = vmul.f32 %v2190_v7, %v1340_v11  ;;  %v1372_v37 = vmul.f32 %v2190_v7, %v1342_v17  ;;  %v1374_v13 = vmul.f32 %v2190_v7, %v1344_v19 }
 0x400   :  { %v2194_v39 = vpop.eup %2193  ;;  %v1377_v60 = vmul.f32 %v2192_v9, %v1347_v55  ;;  %v1371_v57 = vmul.f32 %v2192_v9, %v1341_v30  ;;  %v1373_v12 = vmul.f32 %v2192_v9, %v1343_v28  ;;  %v1375_v34 = vmul.f32 %v2192_v9, %v1345_v49 }
 0x401   :  { %v2196_v53 = vpop.eup %2195  ;;  %v1384_v63 = vmul.f32 %v2194_v39, %v1376_v44  ;;  %v1378_v32 = vmul.f32 %v2178_v35, %v1370_v16  ;;  %v1380_v43 = vmul.f32 %v2182_v18, %v1372_v37  ;;  %v1382_v51 = vmul.f32 %v2186_v40, %v1374_v13  ;;  %v315_v35 = vpop.permute.xlu0 %314  ;;  %v3512_v16 = vld [vmem:[#allocation6_spill] sm:$0xff] }
 0x402   :  { %v1385_v62 = vmul.f32 %v2196_v53, %v1377_v60  ;;  %v1379_v11 = vmul.f32 %v2180_v50, %v1371_v57  ;;  %v1381_v33 = vmul.f32 %v2184_v15, %v1373_v12  ;;  %v1383_v1 = vmul.f32 %v2188_v23, %v1375_v34  ;;  %v3510_v50 = vld [vmem:[#allocation35_spill] sm:$0xff]  ;;  %v3511_v23 = vld [vmem:[#allocation5_spill] sm:$0xff]  ;;  %v1420_v44 = vpop.permute.xlu1 %1419 }
 0x403   :  { %2197 = vtanh.f32 %v1384_v63  ;;  %v758_v18 = vadd.f32 %v3510_v50, %v310_v10  ;;  %v762_v7 = vadd.f32 %v3511_v23, %v315_v35  ;;  %v764_v37 = vadd.f32 %v3512_v16, %v315_v35  ;;  %v3513_v57 = vld [vmem:[#allocation7_spill] sm:$0xff]  ;;  %v3514_v63 = vld [vmem:[#allocation8_spill] sm:$0xff] }
 0x404   :  { %2199 = vtanh.f32 %v1379_v11 }
 0x405   :  { %2201 = vtanh.f32 %v1381_v33  ;;  %v320_v39 = vpop.permute.xlu0 %319 }
 0x406   :  { %2203 = vtanh.f32 %v1378_v32  ;;  %v768_v12 = vadd.f32 %v3513_v57, %v320_v39  ;;  %v770_v32 = vadd.f32 %v3514_v63, %v320_v39  ;;  %v1425_v11 = vpop.permute.xlu1 %1424  ;;  %v3515_v57 = vld [vmem:[#allocation9_spill] sm:$0xff]  ;;  %v3516_v63 = vld [vmem:[#allocation10_spill] sm:$0xff] }
 0x407   :  { %2205 = vtanh.f32 %v1380_v43 }
 0x408   :  { %2207 = vtanh.f32 %v1383_v1 }
 0x409   :  { %2209 = vtanh.f32 %v1385_v62 }
 0x40a   :  { %2211 = vtanh.f32 %v1382_v51 }
 0x40b   :  { %2213 = vtanh.f32 %v750_v42 }
 0x40c   :  { %2215 = vtanh.f32 %v752_v6 }
 0x40d   :  { %v2198_v14 = vpop.eup %2197 }
 0x40e   :  { %v2200_v8 = vpop.eup %2199 }
 0x40f   :  { %v2202_v17 = vpop.eup %2201  ;;  %v3223_v30 = vadd.f32 %v2200_v8, %v3121_v5 }
 0x410   :  { %v2204_v28 = vpop.eup %2203  ;;  %v3226_v19 = vadd.f32 %v2202_v17, %v3124_v54 }
 0x411   :  { %v2206_v49 = vpop.eup %2205  ;;  %v3229_v55 = vadd.f32 %v2204_v28, %v3127_v31  ;;  %v3245_v31 = vadd.f32 %v2198_v14, %v3143_v2  ;;  %v1950_v2 = vld [vmem:[%s3447_s2 + $0x48] sm:$0xff] }
 0x412   :  { %v2208_v41 = vpop.eup %2207  ;;  %v1985_v26 = vpack.c.bf16 %v3226_v19, %v3223_v30  ;;  %v3234_v27 = vadd.f32 %v2206_v49, %v3132_v47 }
 0x413   :  { %v2210_v61 = vpop.eup %2209  ;;  %v3237_v21 = vadd.f32 %v2208_v41, %v3135_v20 }
 0x414   :  { %v2212_v5 = vpop.eup %2211  ;;  %1986 = vmatprep.subr.bf16.mxu1 %v1985_v26  ;;  %v1987_v54 = vpack.c.bf16 %v3234_v27, %v3229_v55  ;;  %v3242_v29 = vadd.f32 %v2210_v61, %v3140_v36  ;;  %v1949_v36 = vld [vmem:[%s3447_s2 + $0x40] sm:$0xff] }
 0x415   :  { %v3248_v46 = vadd.f32 %v2212_v5, %v3146_v58  ;;  %v1951_v58 = vld [vmem:[%s3447_s2 + $0x50] sm:$0xff]  ;;  %v2214_v51 = vpop.eup %2213 }
 0x416   :  { %1988 = vmatpush1.bf16.msra.mxu1 %v1987_v54  ;;  %v1989_v47 = vpack.c.bf16 %v3242_v29, %v3237_v21  ;;  %v2216_v62 = vpop.eup %2215 }
 0x417   :  { %v1991_v20 = vpack.c.bf16 %v3245_v31, %v3248_v46 }
 0x418   :  { %1990 = vmatprep.subr.bf16.mxu1 %v1989_v47 }
 0x41a   :  { %1992 = vmatpush1.bf16.msra.mxu1 %v1991_v20 }
 0x41d   :  { %1953 = vmatmul.mubr.msk.f32.vlgmr.msra.gmra.mrb[44].mxu1 %vm1018_vm1, %v1949_v36 }
 0x41e   :  { %1509 = vmatprep.mubr.f32.mxu1 %v3500_v4 }
 0x421   :  { %1954 = vmatmul.mubr.msk.f32.gmra.mrb[46].mxu1 %vm1018_vm1, %v1950_v2 }
 0x422   :  { %1515 = vmatprep.mubr.f32.mxu1 %v3500_v4 }
 0x425   :  { %1955 = vmatmul.mubr.msk.f32.gmra.mrb[48].mxu1 %vm1018_vm1, %v1951_v58 }
 0x426   :  { %1521 = vmatprep.mubr.f32.mxu1 %v3500_v4 }
 0x429   :  { %1956 = vmatmul.mubr.msk.f32.gmra.mrb[50].mxu1 %vm1018_vm1, %v1952_v0 }
 0x42a   :  { %1707 = vmatprep.mubr.f32.mxu1 %v3500_v4 }
 0x4f0   :  { %v1505_v3 = vpop.f32.mrb[44].mxu1 }
 0x4f1   :  { %v1506_v45 = vadd.f32 %v1505_v3, %v1410_v38  ;;  %v1507_v48 = vpop.f32.mrb[45].mxu1 }
 0x4f2   :  { %v1508_v15 = vadd.f32 %v1507_v48, %v1410_v38 }
 0x4f3   :  { %2217 = vtanh.f32 %v1506_v45 }
 0x4f4   :  { %2219 = vtanh.f32 %v1508_v15  ;;  %v1511_v40 = vpop.f32.mrb[46].mxu1 }
 0x4f5   :  { %2221 = vtanh.f32 %v756_v25  ;;  %v1512_v24 = vadd.f32 %v1511_v40, %v1415_v22  ;;  %v1513_v9 = vpop.f32.mrb[47].mxu1 }
 0x4f6   :  { %2223 = vtanh.f32 %v758_v18  ;;  %v1514_v13 = vadd.f32 %v1513_v9, %v1415_v22 }
 0x4f7   :  { %2225 = vtanh.f32 %v1512_v24 }
 0x4f8   :  { %2227 = vtanh.f32 %v1514_v13  ;;  %v1517_v60 = vpop.f32.mrb[48].mxu1 }
 0x4f9   :  { %2229 = vtanh.f32 %v762_v7  ;;  %v1518_v34 = vadd.f32 %v1517_v60, %v1420_v44  ;;  %v1519_v53 = vpop.f32.mrb[49].mxu1 }
 0x4fa   :  { %2231 = vtanh.f32 %v764_v37  ;;  %v1520_v43 = vadd.f32 %v1519_v53, %v1420_v44  ;;  %v325_v37 = vpop.permute.xlu0 %324  ;;  %v330_v53 = vpop.permute.xlu1 %329 }
 0x4fb   :  { %2233 = vtanh.f32 %v1518_v34 }
 0x4fc   :  { %2235 = vtanh.f32 %v1520_v43  ;;  %v1523_v33 = vpop.f32.mrb[50].mxu1 }
 0x4fd   :  { %v2218_v1 = vpop.eup %2217  ;;  %2237 = vtanh.f32 %v768_v12  ;;  %v1524_v14 = vadd.f32 %v1523_v33, %v1425_v11  ;;  %v1525_v8 = vpop.f32.mrb[51].mxu1  ;;  %v774_v12 = vadd.f32 %v3515_v57, %v325_v37 }
 0x4fe   :  { %v2220_v17 = vpop.eup %2219  ;;  %2239 = vtanh.f32 %v770_v32  ;;  %v3282_v28 = vmul.f32 %v2218_v1, %v2214_v51  ;;  %v1526_v49 = vadd.f32 %v1525_v8, %v1425_v11  ;;  %v776_v32 = vadd.f32 %v3516_v63, %v325_v37  ;;  %v3517_v51 = vld [vmem:[#allocation11_spill] sm:$0xff]  ;;  %v335_v33 = vpop.permute.xlu0 %334  ;;  %v3518_v1 = vld [vmem:[#allocation12_spill] sm:$0xff] }
 0x4ff   :  { %v2222_v41 = vpop.eup %2221  ;;  %v3284_v26 = vmul.f32 %v2220_v17, %v2216_v62  ;;  %2241 = vtanh.f32 %v1524_v14  ;;  %v780_v62 = vadd.f32 %v3517_v51, %v330_v53  ;;  %v782_v14 = vadd.f32 %v3518_v1, %v330_v53  ;;  %v3519_v17 = vld [vmem:[#allocation13_spill] sm:$0xff] }
 0x500   :  { %v2224_v61 = vpop.eup %2223  ;;  %2243 = vtanh.f32 %v1526_v49  ;;  %v1544_v58 = vand.u32 2147483647, %v3282_v28  ;;  %v786_v49 = vadd.f32 %v3519_v17, %v335_v33 }
 0x501   :  { %v2226_v5 = vpop.eup %2225  ;;  %v1545_v10 = vand.u32 2147483647, %v3284_v26  ;;  %2245 = vtanh.f32 %v774_v12 }
 0x502   :  { %v2228_v54 = vpop.eup %2227  ;;  %v3286_v47 = vmul.f32 %v2226_v5, %v2222_v41  ;;  %2247 = vtanh.f32 %v776_v32 }
 0x503   :  { %v2230_v20 = vpop.eup %2229  ;;  %v3288_v36 = vmul.f32 %v2228_v54, %v2224_v61  ;;  %v3520_v61 = vld [vmem:[#allocation14_spill] sm:$0xff]  ;;  %2249 = vtanh.f32 %v780_v62 }
 0x504   :  { %v2232_v2 = vpop.eup %2231  ;;  %v1546_v0 = vand.u32 2147483647, %v3286_v47  ;;  %v788_v5 = vadd.f32 %v3520_v61, %v335_v33  ;;  %2251 = vtanh.f32 %v782_v14 }
 0x505   :  { %v2234_v59 = vpop.eup %2233  ;;  %v1547_v38 = vand.u32 2147483647, %v3288_v36  ;;  %2253 = vtanh.f32 %v786_v49  ;;  %v1960_v49 = vld [vmem:[%s3447_s2 + $0x78] sm:$0xff] }
 0x506   :  { %v2236_v42 = vpop.eup %2235  ;;  %v1552_v56 = vadd.f32 %v1546_v0, %v1544_v58  ;;  %v3298_v6 = vmul.f32 %v2234_v59, %v2230_v20  ;;  %2255 = vtanh.f32 %v788_v5 }
 0x507   :  { %v2238_v22 = vpop.eup %2237  ;;  %v1561_v3 = vadd.f32 %v1547_v38, %v1545_v10  ;;  %v3304_v52 = vmul.f32 %v2236_v42, %v2232_v2  ;;  %v340_v2 = vpop.permute.xlu1 %339  ;;  %v3521_v42 = vld [vmem:[#allocation15_spill] sm:$0xff] }
 0x508   :  { %v2240_v25 = vpop.eup %2239  ;;  %v1548_v45 = vand.u32 2147483647, %v3298_v6 }
 0x509   :  { %v2242_v48 = vpop.eup %2241  ;;  %v1549_v35 = vand.u32 2147483647, %v3304_v52 }
 0x50a   :  { %v2244_v50 = vpop.eup %2243  ;;  %v1553_v18 = vadd.f32 %v1552_v56, %v1548_v45  ;;  %v1542_v15 = vmul.f32 %v2242_v48, %v2238_v22  ;;  %v792_v56 = vadd.f32 %v3521_v42, %v340_v2  ;;  %v3522_v22 = vld [vmem:[#allocation16_spill] sm:$0xff] }
 0x50b   :  { %v1562_v40 = vadd.f32 %v1561_v3, %v1549_v35  ;;  %v1543_v23 = vmul.f32 %v2244_v50, %v2240_v25  ;;  %v794_v3 = vadd.f32 %v3522_v22, %v340_v2  ;;  %v2246_v25 = vpop.eup %2245  ;;  %v350_v61 = vpop.permute.xlu1 %349  ;;  %v3524_v2 = vld [vmem:[#allocation18_spill] sm:$0xff] }
 0x50c   :  { %v1550_v7 = vand.u32 2147483647, %v1542_v15  ;;  %v2248_v48 = vpop.eup %2247 }
 0x50d   :  { %v1551_v24 = vand.u32 2147483647, %v1543_v23  ;;  %v2250_v50 = vpop.eup %2249 }
 0x50e   :  { %v1554_v9 = vadd.f32 %v1553_v18, %v1550_v7  ;;  %v2252_v18 = vpop.eup %2251 }
 0x50f   :  { %v1563_v44 = vadd.f32 %v1562_v40, %v1551_v24  ;;  %v2254_v15 = vpop.eup %2253  ;;  %v1619_v42 = vpop.permute.xlu1 %1618 }
 0x510   :  { %v1555_v16 = vrot.slane %v1554_v9, 4  ;;  %v2256_v40 = vpop.eup %2255 }
 0x511   :  { %v1564_v13 = vrot.slane %v1563_v44, 4 }
 0x512   :  { %v1556_v39 = vadd.f32 %v1555_v16, %v1554_v9 }
 0x513   :  { %v1565_v60 = vadd.f32 %v1564_v13, %v1563_v44 }
 0x514   :  { %v1557_v34 = vrot.slane %v1556_v39, 2 }
 0x515   :  { %v1566_v43 = vrot.slane %v1565_v60, 2 }
 0x516   :  { %v1558_v11 = vadd.f32 %v1557_v34, %v1556_v39 }
 0x517   :  { %v1567_v8 = vadd.f32 %v1566_v43, %v1565_v60 }
 0x518   :  { %v1559_v41 = vrot.slane %v1558_v11, 1 }
 0x519   :  { %v1568_v54 = vrot.slane %v1567_v8, 1 }
 0x51a   :  { %v1560_v20 = vadd.f32 %v1559_v41, %v1558_v11  ;;  %v345_v41 = vpop.permute.xlu0 %344 }
 0x51b   :  { %v1569_v59 = vadd.f32 %v1568_v54, %v1567_v8  ;;  %v3523_v54 = vld [vmem:[#allocation17_spill] sm:$0xff] }
 0x51c   :  { %v1570_v6 = vmax.f32 %v1560_v20, 1e-30  ;;  %v798_v20 = vadd.f32 %v3523_v54, %v345_v41 }
 0x51d   :  { %v1571_v52 = vmax.f32 %v1569_v59, 1e-30  ;;  %v800_v59 = vadd.f32 %v3524_v2, %v345_v41 }
 0x51e   :  { %2257 = vrcp.f32 %v1570_v6  ;;  %v1614_v5 = vpop.permute.xlu0 %1613  ;;  %v3525_v6 = vld [vmem:[#allocation19_spill] sm:$0xff] }
 0x51f   :  { %2259 = vrcp.f32 %v1571_v52  ;;  %v804_v22 = vadd.f32 %v3525_v6, %v350_v61 }
 0x520   :  { %2261 = vtanh.f32 %v792_v56 }
 0x521   :  { %2263 = vtanh.f32 %v794_v3 }
 0x522   :  { %v355_v52 = vpop.permute.xlu0 %354 }
 0x528   :  { %v2258_v23 = vpop.eup %2257 }
 0x529   :  { %v2260_v9 = vpop.eup %2259  ;;  %v1580_v44 = vmul.f32 %v2258_v23, %v1550_v7  ;;  %v1574_v16 = vmul.f32 %v2258_v23, %v1544_v58  ;;  %v1576_v37 = vmul.f32 %v2258_v23, %v1546_v0  ;;  %v1578_v13 = vmul.f32 %v2258_v23, %v1548_v45 }
 0x52a   :  { %v2262_v39 = vpop.eup %2261  ;;  %v1581_v60 = vmul.f32 %v2260_v9, %v1551_v24  ;;  %v1575_v57 = vmul.f32 %v2260_v9, %v1545_v10  ;;  %v1577_v12 = vmul.f32 %v2260_v9, %v1547_v38  ;;  %v1579_v34 = vmul.f32 %v2260_v9, %v1549_v35 }
 0x52b   :  { %v2264_v53 = vpop.eup %2263  ;;  %v1588_v63 = vmul.f32 %v2262_v39, %v1580_v44  ;;  %v1582_v32 = vmul.f32 %v2246_v25, %v1574_v16  ;;  %v1584_v7 = vmul.f32 %v2250_v50, %v1576_v37  ;;  %v1586_v43 = vmul.f32 %v2254_v15, %v1578_v13  ;;  %v3526_v25 = vld [vmem:[#allocation20_spill] sm:$0xff]  ;;  %v3527_v15 = vld [vmem:[#allocation21_spill] sm:$0xff]  ;;  %v1624_v44 = vpop.permute.xlu1 %1623  ;;  %v3528_v16 = vld [vmem:[#allocation22_spill] sm:$0xff] }
 0x52c   :  { %v1589_v28 = vmul.f32 %v2264_v53, %v1581_v60  ;;  %v1583_v58 = vmul.f32 %v2248_v48, %v1575_v57  ;;  %v1585_v51 = vmul.f32 %v2252_v18, %v1577_v12  ;;  %v1587_v47 = vmul.f32 %v2256_v40, %v1579_v34  ;;  %v360_v39 = vpop.permute.xlu0 %359  ;;  %v3529_v57 = vld [vmem:[#allocation23_spill] sm:$0xff] }
 0x52d   :  { %2265 = vtanh.f32 %v1588_v63  ;;  %v806_v48 = vadd.f32 %v3526_v25, %v350_v61  ;;  %v810_v40 = vadd.f32 %v3527_v15, %v355_v52  ;;  %v812_v37 = vadd.f32 %v3528_v16, %v355_v52  ;;  %v3530_v63 = vld [vmem:[#allocation24_spill] sm:$0xff] }
 0x52e   :  { %2267 = vtanh.f32 %v1583_v58  ;;  %v816_v12 = vadd.f32 %v3529_v57, %v360_v39 }
 0x52f   :  { %2269 = vtanh.f32 %v1585_v51  ;;  %v1629_v58 = vpop.permute.xlu1 %1628 }
 0x530   :  { %2271 = vtanh.f32 %v1582_v32  ;;  %v818_v32 = vadd.f32 %v3530_v63, %v360_v39  ;;  %v365_v16 = vpop.permute.xlu0 %364 }
 0x531   :  { %2273 = vtanh.f32 %v1584_v7 }
 0x532   :  { %2275 = vtanh.f32 %v1587_v47 }
 0x533   :  { %2277 = vtanh.f32 %v1589_v28 }
 0x534   :  { %2279 = vtanh.f32 %v1586_v43 }
 0x535   :  { %2281 = vtanh.f32 %v798_v20 }
 0x536   :  { %2283 = vtanh.f32 %v800_v59 }
 0x537   :  { %v2266_v26 = vpop.eup %2265 }
 0x538   :  { %v2268_v36 = vpop.eup %2267 }
 0x539   :  { %v2270_v0 = vpop.eup %2269  ;;  %v3325_v10 = vadd.f32 %v2268_v36, %v3223_v30 }
 0x53a   :  { %v2272_v38 = vpop.eup %2271  ;;  %v3328_v45 = vadd.f32 %v2270_v0, %v3226_v19 }
 0x53b   :  { %v2274_v35 = vpop.eup %2273  ;;  %v3331_v24 = vadd.f32 %v2272_v38, %v3229_v55  ;;  %v3347_v55 = vadd.f32 %v2266_v26, %v3245_v31  ;;  %v1958_v31 = vld [vmem:[%s3447_s2 + $0x68] sm:$0xff] }
 0x53c   :  { %v2276_v62 = vpop.eup %2275  ;;  %v1993_v11 = vpack.c.bf16 %v3328_v45, %v3325_v10  ;;  %v3336_v33 = vadd.f32 %v2274_v35, %v3234_v27 }
 0x53d   :  { %v2278_v1 = vpop.eup %2277  ;;  %v3339_v14 = vadd.f32 %v2276_v62, %v3237_v21 }
 0x53e   :  { %v2280_v30 = vpop.eup %2279  ;;  %1994 = vmatprep.subr.bf16.mxu1 %v1993_v11  ;;  %v1995_v19 = vpack.c.bf16 %v3336_v33, %v3331_v24  ;;  %v3344_v8 = vadd.f32 %v2278_v1, %v3242_v29  ;;  %v1957_v29 = vld [vmem:[%s3447_s2 + $0x60] sm:$0xff] }
 0x53f   :  { %v3350_v17 = vadd.f32 %v2280_v30, %v3248_v46  ;;  %v1959_v46 = vld [vmem:[%s3447_s2 + $0x70] sm:$0xff]  ;;  %v2282_v43 = vpop.eup %2281  ;;  %s2376_s2 = smov [#allocation2]  }
 0x540   :  { %1996 = vmatpush1.bf16.msra.mxu1 %v1995_v19  ;;  %v1997_v27 = vpack.c.bf16 %v3344_v8, %v3339_v14  ;;  %v2284_v28 = vpop.eup %2283  ;;  %s1885_s7 = sshll.u32 %s2376_s2, 4  ;;  %s1886_s7 = int_to_ptr.vmem [resolvable:$true] %s1885_s7 }
 0x541   :  { %v1999_v21 = vpack.c.bf16 %v3347_v55, %v3350_v17  ;;  %s2349_s8 = scalar_lea.vmem %s1886_s7, 32  ;;  %p2354_p1 = scmp.lt.s32.totalorder %s1886_s7, %s1886_s7 }
 0x542   :  { %1998 = vmatprep.subr.bf16.mxu1 %v1997_v27  ;;  %p2350_p0 = scmp.ne.s32.totalorder %s1886_s7, %s2349_s8  ;;  %p2355_p2 = scmp.lt.s32.totalorder %s2349_s8, %s2349_s8 }
 0x544   :  { %2000 = vmatpush1.bf16.msra.mxu1 %v1999_v21  ;;  %p2356_p3 = por %p2355_p2, %p2354_p1 }
 0x546   :  { %p2357_p4 = pnand %p2356_p3, %p2350_p0 }
 0x547   :  { %1961 = vmatmul.mubr.msk.f32.vlgmr.msra.gmra.mrb[52].mxu1 %vm1018_vm1, %v1957_v29 }
 0x548   :  { %1713 = vmatprep.mubr.f32.mxu1 %v3500_v4 }
 0x54b   :  { %1962 = vmatmul.mubr.msk.f32.gmra.mrb[54].mxu1 %vm1018_vm1, %v1958_v31 }
 0x54c   :  { %1719 = vmatprep.mubr.f32.mxu1 %v3500_v4 }
 0x54f   :  { %1963 = vmatmul.mubr.msk.f32.gmra.mrb[56].mxu1 %vm1018_vm1, %v1959_v46 }
 0x550   :  { %1725 = vmatprep.mubr.f32.mxu1 %v3500_v4 }
 0x553   :  { %1964 = vmatmul.mubr.msk.f32.gmra.mrb[58].mxu1 %vm1018_vm1, %v1960_v49 }
 0x61a   :  { %v1709_v56 = vpop.f32.mrb[52].mxu1 }
 0x61b   :  { %v1710_v3 = vadd.f32 %v1709_v56, %v1614_v5  ;;  %v1711_v4 = vpop.f32.mrb[53].mxu1 }
 0x61c   :  { %v1712_v50 = vadd.f32 %v1711_v4, %v1614_v5 }
 0x61d   :  { %2285 = vtanh.f32 %v1710_v3 }
 0x61e   :  { %2287 = vtanh.f32 %v1712_v50  ;;  %v1715_v18 = vpop.f32.mrb[54].mxu1 }
 0x61f   :  { %2289 = vtanh.f32 %v804_v22  ;;  %v1716_v23 = vadd.f32 %v1715_v18, %v1619_v42  ;;  %v1717_v9 = vpop.f32.mrb[55].mxu1 }
 0x620   :  { %2291 = vtanh.f32 %v806_v48  ;;  %v1718_v13 = vadd.f32 %v1717_v9, %v1619_v42 }
 0x621   :  { %2293 = vtanh.f32 %v1716_v23 }
 0x622   :  { %2295 = vtanh.f32 %v1718_v13  ;;  %v1721_v60 = vpop.f32.mrb[56].mxu1 }
 0x623   :  { %2297 = vtanh.f32 %v810_v40  ;;  %v1722_v34 = vadd.f32 %v1721_v60, %v1624_v44  ;;  %v1723_v53 = vpop.f32.mrb[57].mxu1  ;;  %v3531_v60 = vld [vmem:[#allocation25_spill] sm:$0xff] }
 0x624   :  { %2299 = vtanh.f32 %v812_v37  ;;  %v1724_v7 = vadd.f32 %v1723_v53, %v1624_v44  ;;  %v822_v57 = vadd.f32 %v3531_v60, %v365_v16  ;;  %v3532_v53 = vld [vmem:[#allocation26_spill] sm:$0xff] }
 0x625   :  { %2301 = vtanh.f32 %v1722_v34  ;;  %v370_v34 = vpop.permute.xlu1 %369  ;;  %v824_v63 = vadd.f32 %v3532_v53, %v365_v16 }
 0x626   :  { %2303 = vtanh.f32 %v1724_v7  ;;  %v1727_v51 = vpop.f32.mrb[58].mxu1  ;;  %v3533_v7 = vld [vmem:[#allocation27_spill] sm:$0xff] }
 0x627   :  { %v2286_v47 = vpop.eup %2285  ;;  %2305 = vtanh.f32 %v816_v12  ;;  %v1728_v26 = vadd.f32 %v1727_v51, %v1629_v58  ;;  %v1729_v36 = vpop.f32.mrb[59].mxu1  ;;  %v3534_v51 = vld [vmem:[#allocation28_spill] sm:$0xff] }
 0x628   :  { %v2288_v0 = vpop.eup %2287  ;;  %2307 = vtanh.f32 %v818_v32  ;;  %v3383_v38 = vmul.f32 %v2286_v47, %v2282_v43  ;;  %v1730_v35 = vadd.f32 %v1729_v36, %v1629_v58  ;;  %v828_v43 = vadd.f32 %v3533_v7, %v370_v34  ;;  %v375_v58 = vpop.permute.xlu0 %374  ;;  %v3535_v36 = vld [vmem:[#allocation29_spill] sm:$0xff] }
 0x629   :  { %v2290_v62 = vpop.eup %2289  ;;  %v3385_v11 = vmul.f32 %v2288_v0, %v2284_v28  ;;  %2309 = vtanh.f32 %v1728_v26  ;;  %v830_v47 = vadd.f32 %v3534_v51, %v370_v34  ;;  %v834_v0 = vadd.f32 %v3535_v36, %v375_v58 }
 0x62a   :  { %v2292_v1 = vpop.eup %2291  ;;  %2311 = vtanh.f32 %v1730_v35  ;;  %v1748_v46 = vand.u32 2147483647, %v3383_v38 }
 0x62b   :  { %v2294_v30 = vpop.eup %2293  ;;  %v1749_v61 = vand.u32 2147483647, %v3385_v11  ;;  %2313 = vtanh.f32 %v822_v57 }
 0x62c   :  { %v2296_v19 = vpop.eup %2295  ;;  %v3387_v27 = vmul.f32 %v2294_v30, %v2290_v62  ;;  %2315 = vtanh.f32 %v824_v63  ;;  %v3536_v62 = vld [vmem:[#allocation30_spill] sm:$0xff] }
 0x62d   :  { %v2298_v21 = vpop.eup %2297  ;;  %v3389_v29 = vmul.f32 %v2296_v19, %v2292_v1  ;;  %v836_v1 = vadd.f32 %v3536_v62, %v375_v58  ;;  %2317 = vtanh.f32 %v828_v43 }
 0x62e   :  { %v2300_v31 = vpop.eup %2299  ;;  %v1750_v49 = vand.u32 2147483647, %v3387_v27  ;;  %2319 = vtanh.f32 %v830_v47 }
 0x62f   :  { %v2302_v41 = vpop.eup %2301  ;;  %v1751_v5 = vand.u32 2147483647, %v3389_v29  ;;  %2321 = vtanh.f32 %v834_v0 }
 0x630   :  { %v2304_v54 = vpop.eup %2303  ;;  %v1756_v20 = vadd.f32 %v1750_v49, %v1748_v46  ;;  %v3399_v2 = vmul.f32 %v2302_v41, %v2298_v21  ;;  %v380_v21 = vpop.permute.xlu1 %379  ;;  %v3537_v41 = vld [vmem:[#allocation31_spill] sm:$0xff]  ;;  %2323 = vtanh.f32 %v836_v1 }
 0x631   :  { %v2306_v59 = vpop.eup %2305  ;;  %v1765_v42 = vadd.f32 %v1751_v5, %v1749_v61  ;;  %v3405_v56 = vmul.f32 %v2304_v54, %v2300_v31  ;;  %v840_v54 = vadd.f32 %v3537_v41, %v380_v21 }
 0x632   :  { %v2308_v6 = vpop.eup %2307  ;;  %v1752_v22 = vand.u32 2147483647, %v3399_v2  ;;  %v3538_v2 = vld [vmem:[#allocation32_spill] sm:$0xff] }
 0x633   :  { %v2310_v3 = vpop.eup %2309  ;;  %v1753_v4 = vand.u32 2147483647, %v3405_v56 }
 0x634   :  { %v2312_v52 = vpop.eup %2311  ;;  %v1757_v25 = vadd.f32 %v1756_v20, %v1752_v22  ;;  %v1746_v48 = vmul.f32 %v2310_v3, %v2306_v59  ;;  %v842_v59 = vadd.f32 %v3538_v2, %v380_v21 }
 0x635   :  { %v1766_v50 = vadd.f32 %v1765_v42, %v1753_v4  ;;  %v1747_v18 = vmul.f32 %v2312_v52, %v2308_v6  ;;  %v2314_v56 = vpop.eup %2313 }
 0x636   :  { %v1754_v15 = vand.u32 2147483647, %v1746_v48  ;;  %v2316_v6 = vpop.eup %2315 }
 0x637   :  { %v1755_v40 = vand.u32 2147483647, %v1747_v18  ;;  %v2318_v3 = vpop.eup %2317 }
 0x638   :  { %v1758_v23 = vadd.f32 %v1757_v25, %v1754_v15  ;;  %v2320_v52 = vpop.eup %2319 }
 0x639   :  { %v1767_v9 = vadd.f32 %v1766_v50, %v1755_v40  ;;  %v2322_v25 = vpop.eup %2321 }
 0x63a   :  { %v1759_v44 = vrot.slane %v1758_v23, 4  ;;  %v2324_v48 = vpop.eup %2323 }
 0x63b   :  { %v1768_v37 = vrot.slane %v1767_v9, 4 }
 0x63c   :  { %v1760_v13 = vadd.f32 %v1759_v44, %v1758_v23 }
 0x63d   :  { %v1769_v39 = vadd.f32 %v1768_v37, %v1767_v9 }
 0x63e   :  { %v1761_v12 = vrot.slane %v1760_v13, 2 }
 0x63f   :  { %v1770_v32 = vrot.slane %v1769_v39, 2 }
 0x640   :  { %v1762_v28 = vadd.f32 %v1761_v12, %v1760_v13 }
 0x641   :  { %v1771_v26 = vadd.f32 %v1770_v32, %v1769_v39 }
 0x642   :  { %v1763_v35 = vrot.slane %v1762_v28, 1 }
 0x643   :  { %v1772_v30 = vrot.slane %v1771_v26, 1 }
 0x644   :  { %v1764_v19 = vadd.f32 %v1763_v35, %v1762_v28 }
 0x645   :  { %v1773_v31 = vadd.f32 %v1772_v30, %v1771_v26 }
 0x646   :  { %v1774_v20 = vmax.f32 %v1764_v19, 1e-30 }
 0x647   :  { %v1775_v42 = vmax.f32 %v1773_v31, 1e-30 }
 0x648   :  { %2325 = vrcp.f32 %v1774_v20 }
 0x649   :  { %2327 = vrcp.f32 %v1775_v42 }
 0x64a   :  { %2329 = vtanh.f32 %v840_v54 }
 0x64b   :  { %2331 = vtanh.f32 %v842_v59 }
 0x652   :  { %v2326_v50 = vpop.eup %2325 }
 0x653   :  { %v2328_v18 = vpop.eup %2327  ;;  %v1784_v23 = vmul.f32 %v2326_v50, %v1754_v15  ;;  %v1778_v9 = vmul.f32 %v2326_v50, %v1748_v46  ;;  %v1780_v44 = vmul.f32 %v2326_v50, %v1750_v49  ;;  %v1782_v16 = vmul.f32 %v2326_v50, %v1752_v22 }
 0x654   :  { %v2330_v37 = vpop.eup %2329  ;;  %v1785_v13 = vmul.f32 %v2328_v18, %v1755_v40  ;;  %v1779_v39 = vmul.f32 %v2328_v18, %v1749_v61  ;;  %v1781_v60 = vmul.f32 %v2328_v18, %v1751_v5  ;;  %v1783_v57 = vmul.f32 %v2328_v18, %v1753_v4  ;;  %v1813_v61 = vpop.permute.xlu0 %1812 }
 0x655   :  { %v2332_v12 = vpop.eup %2331  ;;  %v1792_v34 = vmul.f32 %v2330_v37, %v1784_v23  ;;  %v1786_v53 = vmul.f32 %v2314_v56, %v1778_v9  ;;  %v1788_v15 = vmul.f32 %v2318_v3, %v1780_v44  ;;  %v1790_v63 = vmul.f32 %v2322_v25, %v1782_v16  ;;  %v1818_v40 = vpop.permute.xlu1 %1817 }
 0x656   :  { %v1793_v38 = vmul.f32 %v2332_v12, %v1785_v13  ;;  %v1787_v46 = vmul.f32 %v2316_v6, %v1779_v39  ;;  %v1789_v32 = vmul.f32 %v2320_v52, %v1781_v60  ;;  %v1791_v27 = vmul.f32 %v2324_v48, %v1783_v57 }
 0x657   :  { %2333 = vtanh.f32 %v1792_v34  ;;  %v2375_v3 = vmov 1966171168   ;;  %v1862_v52 = vlaneseq }
 0x658   :  { %2335 = vtanh.f32 %v1793_v38  ;;  %v1823_v1 = vpop.permute.xlu0 %1822 }
 0x659   :  { %2337 = vtanh.f32 %v1786_v53  ;;  %v1863_v23 = vshrl.u32 %v1862_v52, 7  ;;  %vm1876_vm2 = vcmp.lt.s32.totalorder %v1862_v52, 256 }
 0x65a   :  { %2339 = vtanh.f32 %v1787_v46 }
 0x65b   :  { %2341 = vtanh.f32 %v1788_v15 }
 0x65c   :  { %2343 = vtanh.f32 %v1789_v32 }
 0x65d   :  { %2345 = vtanh.f32 %v1790_v63 }
 0x65e   :  { %2347 = vtanh.f32 %v1791_v27 }
 0x661   :  { %v2334_v11 = vpop.eup %2333 }
 0x662   :  { %v2336_v29 = vpop.eup %2335  ;;  %v1808_v35 = vadd.f32 %v2334_v11, %v3347_v55 }
 0x663   :  { %v2338_v49 = vpop.eup %2337  ;;  %v1809_v30 = vadd.f32 %v2336_v29, %v3344_v8 }
 0x664   :  { %v2340_v5 = vpop.eup %2339  ;;  %v1802_v22 = vadd.f32 %v2338_v49, %v3331_v24 }
 0x665   :  { %v2342_v4 = vpop.eup %2341  ;;  %v1803_v7 = vadd.f32 %v2340_v5, %v3325_v10 }
 0x666   :  { %v2344_v43 = vpop.eup %2343  ;;  %v1804_v28 = vadd.f32 %v2342_v4, %v3336_v33  ;;  %v1830_v58 = vmul.f32 %v1813_v61, %v1802_v22  ;;  %v1828_v33 = vpop.permute.xlu1 %1827 }
 0x667   :  { %v2346_v51 = vpop.eup %2345  ;;  %v1805_v47 = vadd.f32 %v2344_v43, %v3328_v45  ;;  %v1831_v26 = vmul.f32 %v1813_v61, %v1803_v7  ;;  %v1836_v54 = vmul.f32 %v1828_v33, %v1808_v35  ;;  %v1837_v20 = vmul.f32 %v1828_v33, %v1809_v30 }
 0x668   :  { %v2348_v36 = vpop.eup %2347  ;;  %v1806_v0 = vadd.f32 %v2346_v51, %v3350_v17  ;;  %v1832_v62 = vmul.f32 %v1818_v40, %v1804_v28 }
 0x669   :  { %v1807_v24 = vadd.f32 %v2348_v36, %v3339_v14  ;;  %v1833_v10 = vmul.f32 %v1818_v40, %v1805_v47  ;;  %v1860_v14 = vunpack.c.l.s4 %v2375_v3 }
 0x66a   :  { %v1834_v19 = vmul.f32 %v1823_v1, %v1806_v0  ;;  %v1838_v21 = vadd.f32 %v1832_v62, %v1830_v58 }
 0x66b   :  { %v1835_v31 = vmul.f32 %v1823_v1, %v1807_v24  ;;  %v1847_v41 = vadd.f32 %v1833_v10, %v1831_v26  ;;  %v1861_v18 = vunpack.c.0.s8 %v1860_v14 }
 0x66c   :  { %v1839_v45 = vadd.f32 %v1838_v21, %v1834_v19 }
 0x66d   :  { %v1848_v2 = vadd.f32 %v1847_v41, %v1835_v31  ;;  %v1864_v13 = vsub.s32 %v1861_v18, %v1863_v23 }
 0x66e   :  { %v1840_v59 = vadd.f32 %v1839_v45, %v1836_v54 }
 0x66f   :  { %v1849_v17 = vadd.f32 %v1848_v2, %v1837_v20 }
 0x670   :  { %v1841_v42 = vrot.slane %v1840_v59, 4 }
 0x671   :  { %v1850_v55 = vrot.slane %v1849_v17, 4 }
 0x672   :  { %v1842_v56 = vadd.f32 %v1841_v42, %v1840_v59 }
 0x673   :  { %v1851_v6 = vadd.f32 %v1850_v55, %v1849_v17 }
 0x674   :  { %v1843_v8 = vrot.slane %v1842_v56, 2 }
 0x675   :  { %v1852_v25 = vrot.slane %v1851_v6, 2 }
 0x676   :  { %v1844_v48 = vadd.f32 %v1843_v8, %v1842_v56 }
 0x677   :  { %v1853_v50 = vadd.f32 %v1852_v25, %v1851_v6 }
 0x678   :  { %v1845_v9 = vrot.slane %v1844_v48, 1 }
 0x679   :  { %v1854_v44 = vrot.slane %v1853_v50, 1 }
 0x67a   :  { %v1846_v16 = vadd.f32 %v1845_v9, %v1844_v48 }
 0x67b   :  { %v1855_v37 = vadd.f32 %v1854_v44, %v1853_v50 }
 0x67d   :  { %v1858_v39 = vcombine.low %v1846_v16, %v1855_v37 }
 0x67f   :  { %v1865_v60 = vrot.slane %v1858_v39, %v1864_v13 }
 0x681   :  { %v1872_v57 = vrot.slane %v1865_v60, %v1864_v13 }
 0x683   :  { %1878 = vst.msk [vmem:[#allocation2] sm:$0x3] %vm1876_vm2, %v1872_v57 }
 0x684   :  { %2360 = shalt.err (!%p2357_p4)
}
 0x685   :  { %s2361_s11 = scalar_lea.hbm %s3449_s4, 32 }
 0x686   :  { %p2362_p5 = scmp.ne.s32.totalorder %s3449_s4, %s2361_s11  ;;  %p2365_p6 = scmp.lt.u32.totalorder %s2361_s11, %s3449_s4 }
 0x688   :  { %p2367_p7 = pnand %p2365_p6, %p2362_p5 }
 0x68a   :  { %2370 = shalt.err (!%p2367_p7)
}
 0x68b   :  { %1888 = dma.vmem_to_hbm [thread:$0]  %s1886_s7, 32, %s3449_s4, [#allocation3]  }
 0x68c   :  { %2371 = dma.done.wait [#allocation3], 32  }
 0x68d   :  { %2372 = vsyncadd [#allocation3], 4294967264 }
 0x68e   :  { %1892 = vsyncpa [#allocation3], 1 }

</bundles_post_ra>
